<compile_context>
chip_gen: v7x
topology: tpu7x:2x2x1
jax: 0.10.0
libtpu: 0.0.40
codegen_flags: <defaults>
</compile_context>

<pallas_src>
import functools
import math

import numpy as np
import jax
import jax.numpy as jnp
from jax import lax
from jax.experimental import pallas as pl
from jax.experimental.pallas import tpu as pltpu


# ----------------------------------------------------------------------------
# 2D sin/cos positional embedding (standard MAE recipe), computed in numpy.
# ----------------------------------------------------------------------------
def _get_1d_sincos(embed_dim, pos):
    assert embed_dim % 2 == 0
    omega = np.arange(embed_dim // 2, dtype=np.float64)
    omega /= embed_dim / 2.0
    omega = 1.0 / 10000 ** omega
    pos = pos.reshape(-1)
    out = np.einsum("m,d->md", pos, omega)
    return np.concatenate([np.sin(out), np.cos(out)], axis=1)


def get_2d_sincos_pos_embed(embed_dim, grid_size):
    assert embed_dim % 4 == 0
    grid_h = np.arange(grid_size, dtype=np.float64)
    grid_w = np.arange(grid_size, dtype=np.float64)
    grid = np.meshgrid(grid_w, grid_h)              # w first, then h
    grid = np.stack(grid, axis=0).reshape(2, 1, grid_size, grid_size)
    emb_h = _get_1d_sincos(embed_dim // 2, grid[0])
    emb_w = _get_1d_sincos(embed_dim // 2, grid[1])
    return np.concatenate([emb_h, emb_w], axis=1)   # (grid_size**2, embed_dim)


def _layer_norm(h, g, b, eps):
    mu = jnp.mean(h, axis=-1, keepdims=True)
    var = jnp.mean((h - mu) ** 2, axis=-1, keepdims=True)
    return (h - mu) * lax.rsqrt(var + eps) * g + b


# ----------------------------------------------------------------------------
# Fused kernel: in_proj + pos (l==0), `depth` pre-LN encoder layers (one per
# grid step), final LN + to_patch (l==depth-1).  Residual stream in VMEM scratch.
# ----------------------------------------------------------------------------
def reconstructor_kernel(
    lat_ref, wproj_ref, pos_ref,
    ln1g_ref, ln1b_ref, wq_ref, bq_ref, wk_ref, bk_ref, wv_ref, bv_ref,
    wo_ref, bo_ref, ln2g_ref, ln2b_ref, w1_ref, b1_ref, w2_ref, b2_ref,
    lnfg_ref, lnfb_ref, wpatch_ref, bpatch_ref,
    out_ref,
    x_ref,
    *, n_heads, seq_len, eps=1e-5,
):
    l = pl.program_id(0)
    depth = pl.num_programs(0)
    rows, dim = x_ref.shape
    n_batch = rows // seq_len
    dh = dim // n_heads
    scale = 1.0 / math.sqrt(dh)
    bf16 = jnp.bfloat16

    # ---- l == 0: fused input projection + fixed positional embedding --------
    @pl.when(l == 0)
    def _():
        pos = pos_ref[...]                                   # (N, D) f32
        wproj = wproj_ref[...]                               # (Din, D) bf16

        def init_body(b, carry):
            r0 = pl.multiple_of(b * seq_len, seq_len)
            lat_b = lat_ref[pl.ds(r0, seq_len), :]           # (N, Din) bf16
            x_ref[pl.ds(r0, seq_len), :] = (
                jnp.dot(lat_b, wproj, preferred_element_type=jnp.float32) + pos)
            return carry

        lax.fori_loop(0, n_batch, init_body, 0)

    # ---- one pre-LN transformer encoder layer --------------------------------
    ln1g = ln1g_ref[0]; ln1b = ln1b_ref[0]
    ln2g = ln2g_ref[0]; ln2b = ln2b_ref[0]
    wq = wq_ref[0]; bq = bq_ref[0]
    wk = wk_ref[0]; bk = bk_ref[0]
    wv = wv_ref[0]; bv = bv_ref[0]
    wo = wo_ref[0]; bo = bo_ref[0]
    w1 = w1_ref[0]; b1 = b1_ref[0]
    w2 = w2_ref[0]; b2 = b2_ref[0]

    def layer_body(b, carry):
        r0 = pl.multiple_of(b * seq_len, seq_len)
        xb = x_ref[pl.ds(r0, seq_len), :]                    # (N, D) f32

        # --- pre-LN multi-head self-attention ---
        hb = _layer_norm(xb, ln1g, ln1b, eps).astype(bf16)
        q = (jnp.dot(hb, wq, preferred_element_type=jnp.float32) + bq).astype(bf16)
        k = (jnp.dot(hb, wk, preferred_element_type=jnp.float32) + bk).astype(bf16)
        v = (jnp.dot(hb, wv, preferred_element_type=jnp.float32) + bv).astype(bf16)

        head_outs = []
        for hi in range(n_heads):                            # small static loop
            c = hi * dh
            qh = q[:, c:c + dh]
            kh = k[:, c:c + dh]
            vh = v[:, c:c + dh]
            s = jnp.einsum("qd,kd->qk", qh, kh,
                           preferred_element_type=jnp.float32) * scale
            s = s - jnp.max(s, axis=-1, keepdims=True)
            p = jnp.exp(s)
            p = p / jnp.sum(p, axis=-1, keepdims=True)       # exact softmax
            head_outs.append(
                jnp.dot(p.astype(bf16), vh,
                        preferred_element_type=jnp.float32).astype(bf16))
        ctx = jnp.concatenate(head_outs, axis=-1)            # (N, D) bf16
        xb = xb + jnp.dot(ctx, wo, preferred_element_type=jnp.float32) + bo

        # --- pre-LN MLP (ReLU, 4x expansion) ---
        hb = _layer_norm(xb, ln2g, ln2b, eps).astype(bf16)
        m = jnp.maximum(
            jnp.dot(hb, w1, preferred_element_type=jnp.float32) + b1, 0.0
        ).astype(bf16)                                       # (N, 4D) bf16
        xb = xb + jnp.dot(m, w2, preferred_element_type=jnp.float32) + b2

        x_ref[pl.ds(r0, seq_len), :] = xb
        return carry

    lax.fori_loop(0, n_batch, layer_body, 0)

    # ---- l == depth-1: fused final LayerNorm + to_patch projection ----------
    @pl.when(l == depth - 1)
    def _():
        lnfg = lnfg_ref[...]; lnfb = lnfb_ref[...]
        wpatch = wpatch_ref[...]; bpatch = bpatch_ref[...]

        def head_body(b, carry):
            r0 = pl.multiple_of(b * seq_len, seq_len)
            hb = _layer_norm(x_ref[pl.ds(r0, seq_len), :], lnfg, lnfb, eps)
            out_ref[pl.ds(r0, seq_len), :] = (
                jnp.dot(hb.astype(bf16), wpatch,
                        preferred_element_type=jnp.float32) + bpatch)
            return carry

        lax.fori_loop(0, n_batch, head_body, 0)


# ----------------------------------------------------------------------------
# Wrapper: weight prep (bf16, qkv split, lane padding), pallas_call, unpatchify.
# ----------------------------------------------------------------------------
def _round_up(x, m):
    return (x + m - 1) // m * m


def _vmem_limit_bytes():
    """Per-generation scoped-VMEM limit: ~52 MiB on v7x, ~112 MiB on v5e/v6e."""
    try:
        cap = pltpu.get_tpu_info().vmem_capacity_bytes
    except Exception:
        cap = 128 * 1024 * 1024
    headroom = 12 * 1024 * 1024
    return int(max(32 * 1024 * 1024, min(cap - headroom, 112 * 1024 * 1024)))


def prepare_params(params):
    """Cast matmul weights to bf16, split qkv, pad to_patch lane-dense."""
    bf16 = jnp.bfloat16
    D, PP3 = params["wpatch"].shape
    PP3_pad = _round_up(max(PP3, 128), 128)
    wq, wk, wv = jnp.split(params["wqkv"], 3, axis=-1)
    bq, bk, bv = jnp.split(params["bqkv"], 3, axis=-1)
    return dict(
        wproj=params["wproj"].astype(bf16),
        pos=params["pos"][0],                                   # (N, D) f32
        ln1g=params["ln1g"], ln1b=params["ln1b"],
        wq=wq.astype(bf16), bq=bq,
        wk=wk.astype(bf16), bk=bk,
        wv=wv.astype(bf16), bv=bv,
        wo=params["wo"].astype(bf16), bo=params["bo"],
        ln2g=params["ln2g"], ln2b=params["ln2b"],
        w1=params["w1"].astype(bf16), b1=params["b1"],
        w2=params["w2"].astype(bf16), b2=params["b2"],
        lnfg=params["lnfg"], lnfb=params["lnfb"],
        wpatch=jnp.zeros((D, PP3_pad), bf16).at[:, :PP3].set(
            params["wpatch"].astype(bf16)),
        bpatch=jnp.zeros((1, PP3_pad), jnp.float32).at[:, :PP3].set(
            params["bpatch"]),
    )


def reconstructor_forward(latent, kp, *, n_heads, patch_size, H, W):
    B, N, Din = latent.shape
    D = kp["wproj"].shape[1]
    depth = kp["wq"].shape[0]
    PP3 = 3 * patch_size * patch_size
    PP3_pad = kp["wpatch"].shape[1]
    BN = B * N

    lat2d = latent.reshape(BN, Din).astype(jnp.bfloat16)

    def const2d(shape):
        return pl.BlockSpec(shape, lambda l: (0, 0))

    def per_layer(shape):
        nz = len(shape) - 1
        return pl.BlockSpec((1,) + shape[1:],
                            lambda l, _nz=nz: (l,) + (0,) * _nz)

    layer_names = ("ln1g", "ln1b", "wq", "bq", "wk", "bk", "wv", "bv",
                   "wo", "bo", "ln2g", "ln2b", "w1", "b1", "w2", "b2")

    in_specs = (
        [const2d((BN, Din)), const2d((Din, D)), const2d((N, D))]
        + [per_layer(kp[n].shape) for n in layer_names]
        + [const2d((1, D)), const2d((1, D)),
           const2d((D, PP3_pad)), const2d((1, PP3_pad))]
    )

    out_pad = pl.pallas_call(
        functools.partial(reconstructor_kernel, n_heads=n_heads, seq_len=N),
        out_shape=jax.ShapeDtypeStruct((BN, PP3_pad), jnp.float32),
        grid_spec=pltpu.PrefetchScalarGridSpec(
            num_scalar_prefetch=0,
            grid=(depth,),
            in_specs=in_specs,
            out_specs=const2d((BN, PP3_pad)),
            scratch_shapes=[pltpu.VMEM((BN, D), jnp.float32)],
        ),
        compiler_params=pltpu.CompilerParams(
            dimension_semantics=("arbitrary",),
            vmem_limit_bytes=_vmem_limit_bytes()),
    )(lat2d, kp["wproj"], kp["pos"],
      *[kp[n] for n in layer_names],
      kp["lnfg"], kp["lnfb"], kp["wpatch"], kp["bpatch"])

    patches = out_pad[:, :PP3].reshape(B, N, PP3)
    return unpatchify(patches, B, H, W, patch_size)


def unpatchify(patches, B, H, W, P):
    # (B, N, 3*P*P) -> (B, H, W, 3, P, P) -> NCHW image (B, 3, H*P, W*P)
    img = patches.reshape(B, H, W, 3, P, P)
    img = jnp.transpose(img, (0, 3, 1, 4, 2, 5))
    return img.reshape(B, 3, H * P, W * P)


# ----------------------------------------------------------------------------
# Deterministic synthetic parameters (weights stored (in, out) orientation, f32).
# ----------------------------------------------------------------------------
def init_params(key, *, input_dim, hidden_dim, depth, patch_size, grid_size):
    D = hidden_dim
    PP3 = 3 * patch_size * patch_size
    std = 0.02
    ks = jax.random.split(key, 10)
    pos = jnp.asarray(get_2d_sincos_pos_embed(D, grid_size), jnp.float32)[None]
    return dict(
        wproj=jax.random.normal(ks[0], (input_dim, D), jnp.float32) * std,
        pos=pos,                                                      # (1, N, D)
        ln1g=jnp.ones((depth, 1, D), jnp.float32),
        ln1b=jnp.zeros((depth, 1, D), jnp.float32),
        wqkv=jax.random.normal(ks[1], (depth, D, 3 * D), jnp.float32) * std,
        bqkv=jax.random.normal(ks[2], (depth, 1, 3 * D), jnp.float32) * std,
        wo=jax.random.normal(ks[3], (depth, D, D), jnp.float32) * std,
        bo=jax.random.normal(ks[4], (depth, 1, D), jnp.float32) * std,
        ln2g=jnp.ones((depth, 1, D), jnp.float32),
        ln2b=jnp.zeros((depth, 1, D), jnp.float32),
        w1=jax.random.normal(ks[5], (depth, D, 4 * D), jnp.float32) * std,
        b1=jax.random.normal(ks[6], (depth, 1, 4 * D), jnp.float32) * std,
        w2=jax.random.normal(ks[7], (depth, 4 * D, D), jnp.float32) * std,
        b2=jnp.zeros((depth, 1, D), jnp.float32),
        lnfg=jnp.ones((1, D), jnp.float32),
        lnfb=jnp.zeros((1, D), jnp.float32),
        wpatch=jax.random.normal(ks[8], (D, PP3), jnp.float32) * std,
        bpatch=jax.random.normal(ks[9], (1, PP3), jnp.float32) * std,
    )


# ----------------------------------------------------------------------------
# Pure-JAX f32 reference (same math as the PyTorch module in eval mode).
# ----------------------------------------------------------------------------
def ref_forward(latent, params, *, n_heads, patch_size, H, W, eps=1e-5):
    x = latent @ params["wproj"] + params["pos"]
    B, N, D = x.shape
    dh = D // n_heads

    def ln(h, g, b):
        mu = h.mean(-1, keepdims=True)
        var = ((h - mu) ** 2).mean(-1, keepdims=True)
        return (h - mu) / jnp.sqrt(var + eps) * g + b

    depth = params["wqkv"].shape[0]
    for li in range(depth):
        h = ln(x, params["ln1g"][li], params["ln1b"][li])
        qkv = h @ params["wqkv"][li] + params["bqkv"][li]
        q, k, v = jnp.split(qkv, 3, axis=-1)
        q = q.reshape(B, N, n_heads, dh).transpose(0, 2, 1, 3)
        k = k.reshape(B, N, n_heads, dh).transpose(0, 2, 1, 3)
        v = v.reshape(B, N, n_heads, dh).transpose(0, 2, 1, 3)
        s = jnp.einsum("bhqd,bhkd->bhqk", q, k) / math.sqrt(dh)
        p = jax.nn.softmax(s, axis=-1)
        o = jnp.einsum("bhqk,bhkd->bhqd", p, v).transpose(0, 2, 1, 3).reshape(B, N, D)
        x = x + o @ params["wo"][li] + params["bo"][li]
        h = ln(x, params["ln2g"][li], params["ln2b"][li])
        h = jax.nn.relu(h @ params["w1"][li] + params["b1"][li])
        x = x + h @ params["w2"][li] + params["b2"][li]
    x = ln(x, params["lnfg"], params["lnfb"])
    patches = x @ params["wpatch"] + params["bpatch"]
    return unpatchify(patches, B, H, W, patch_size)


if __name__ == "__main__":
    # Small config: image_size=16, patch_size=4 -> H=W=4, N=16 patches.
    image_size, patch_size = 16, 4
    input_dim, hidden_dim = 32, 32
    depth, n_heads = 2, 2
    H = W = image_size // patch_size
    N = H * W
    B = 2

    key = jax.random.PRNGKey(0)
    k_param, k_in = jax.random.split(key)
    params = init_params(k_param, input_dim=input_dim, hidden_dim=hidden_dim,
                         depth=depth, patch_size=patch_size, grid_size=H)
    latent = jax.random.normal(k_in, (B, N, input_dim), jnp.float32)
    kparams = prepare_params(params)

    ref = jax.block_until_ready(
        ref_forward(latent, params, n_heads=n_heads,
                    patch_size=patch_size, H=H, W=W))

    img = jax.block_until_ready(
        reconstructor_forward(latent, kparams, n_heads=n_heads,
                              patch_size=patch_size, H=H, W=W))
    assert img.shape == (B, 3, image_size, image_size), img.shape
    assert np.allclose(np.asarray(img), np.asarray(ref),
                       atol=2e-2, rtol=2e-2), "mismatch vs f32 reference"

    print("KERNEL_OK")
</pallas_src>

<mosaic_0001>
module attributes {stable_mosaic.version = 11 : i64} {
  func.func @reconstructor_kernel(%arg0: i32, %arg1: memref<32x32xbf16, #tpu.memory_space<vmem>>, %arg2: memref<32x32xbf16, #tpu.memory_space<vmem>>, %arg3: memref<16x32xf32, #tpu.memory_space<vmem>>, %arg4: memref<1x1x32xf32, #tpu.memory_space<vmem>>, %arg5: memref<1x1x32xf32, #tpu.memory_space<vmem>>, %arg6: memref<1x32x32xbf16, #tpu.memory_space<vmem>>, %arg7: memref<1x1x32xf32, #tpu.memory_space<vmem>>, %arg8: memref<1x32x32xbf16, #tpu.memory_space<vmem>>, %arg9: memref<1x1x32xf32, #tpu.memory_space<vmem>>, %arg10: memref<1x32x32xbf16, #tpu.memory_space<vmem>>, %arg11: memref<1x1x32xf32, #tpu.memory_space<vmem>>, %arg12: memref<1x32x32xbf16, #tpu.memory_space<vmem>>, %arg13: memref<1x1x32xf32, #tpu.memory_space<vmem>>, %arg14: memref<1x1x32xf32, #tpu.memory_space<vmem>>, %arg15: memref<1x1x32xf32, #tpu.memory_space<vmem>>, %arg16: memref<1x32x128xbf16, #tpu.memory_space<vmem>>, %arg17: memref<1x1x128xf32, #tpu.memory_space<vmem>>, %arg18: memref<1x128x32xbf16, #tpu.memory_space<vmem>>, %arg19: memref<1x1x32xf32, #tpu.memory_space<vmem>>, %arg20: memref<1x32xf32, #tpu.memory_space<vmem>>, %arg21: memref<1x32xf32, #tpu.memory_space<vmem>>, %arg22: memref<32x128xbf16, #tpu.memory_space<vmem>>, %arg23: memref<1x128xf32, #tpu.memory_space<vmem>>, %arg24: memref<32x128xf32, #tpu.memory_space<vmem>>, %arg25: memref<32x32xf32, #tpu.memory_space<vmem>>) attributes {dimension_semantics = [#tpu.dimension_semantics<arbitrary>], iteration_bounds = array<i64: 2>, scalar_prefetch = 0 : i64, scratch_operands = 1 : i64, tpu.core_type = #tpu.core_type<tc>, window_params = [{pipeline_mode = #tpu.pipeline_mode<synchronous>, transform_indices = @transform_0, window_bounds = array<i64: 32, 32>}, {pipeline_mode = #tpu.pipeline_mode<synchronous>, transform_indices = @transform_1, window_bounds = array<i64: 32, 32>}, {pipeline_mode = #tpu.pipeline_mode<synchronous>, transform_indices = @transform_2, window_bounds = array<i64: 16, 32>}, {transform_indices = @transform_3, window_bounds = array<i64: 1, 1, 32>}, {transform_indices = @transform_4, window_bounds = array<i64: 1, 1, 32>}, {transform_indices = @transform_5, window_bounds = array<i64: 1, 32, 32>}, {transform_indices = @transform_6, window_bounds = array<i64: 1, 1, 32>}, {transform_indices = @transform_7, window_bounds = array<i64: 1, 32, 32>}, {transform_indices = @transform_8, window_bounds = array<i64: 1, 1, 32>}, {transform_indices = @transform_9, window_bounds = array<i64: 1, 32, 32>}, {transform_indices = @transform_10, window_bounds = array<i64: 1, 1, 32>}, {transform_indices = @transform_11, window_bounds = array<i64: 1, 32, 32>}, {transform_indices = @transform_12, window_bounds = array<i64: 1, 1, 32>}, {transform_indices = @transform_13, window_bounds = array<i64: 1, 1, 32>}, {transform_indices = @transform_14, window_bounds = array<i64: 1, 1, 32>}, {transform_indices = @transform_15, window_bounds = array<i64: 1, 32, 128>}, {transform_indices = @transform_16, window_bounds = array<i64: 1, 1, 128>}, {transform_indices = @transform_17, window_bounds = array<i64: 1, 128, 32>}, {transform_indices = @transform_18, window_bounds = array<i64: 1, 1, 32>}, {pipeline_mode = #tpu.pipeline_mode<synchronous>, transform_indices = @transform_19, window_bounds = array<i64: 1, 32>}, {pipeline_mode = #tpu.pipeline_mode<synchronous>, transform_indices = @transform_20, window_bounds = array<i64: 1, 32>}, {pipeline_mode = #tpu.pipeline_mode<synchronous>, transform_indices = @transform_21, window_bounds = array<i64: 32, 128>}, {pipeline_mode = #tpu.pipeline_mode<synchronous>, transform_indices = @transform_22, window_bounds = array<i64: 1, 128>}, {pipeline_mode = #tpu.pipeline_mode<synchronous>, transform_indices = @transform_23, window_bounds = array<i64: 32, 128>}]} {
    %c0_i32 = arith.constant 0 : i32
    %0 = arith.cmpi eq, %arg0, %c0_i32 : i32
    %1 = arith.extui %0 : i1 to i32
    %c0_i32_0 = arith.constant 0 : i32
    %2 = arith.cmpi ne, %1, %c0_i32_0 : i32
    scf.if %2 {
      %c0_52 = arith.constant 0 : index
      %c0_53 = arith.constant 0 : index
      %39 = vector.load %arg3[%c0_52, %c0_53] : memref<16x32xf32, #tpu.memory_space<vmem>>, vector<16x32xf32>
      %c0_54 = arith.constant 0 : index
      %c0_55 = arith.constant 0 : index
      %40 = vector.load %arg2[%c0_54, %c0_55] : memref<32x32xbf16, #tpu.memory_space<vmem>>, vector<32x32xbf16>
      %c0_i32_56 = arith.constant 0 : i32
      %c2_i32_57 = arith.constant 2 : i32
      %41 = arith.addi %c0_i32_56, %c2_i32_57 : i32
      %c1_i32_58 = arith.constant 1 : i32
      scf.for %arg26 = %c0_i32_56 to %41 step %c1_i32_58  : i32 {
        %c16_i32 = arith.constant 16 : i32
        %42 = arith.muli %arg26, %c16_i32 : i32
        %43 = tpu.assume_multiple %42, 16 : i32
        %44 = arith.index_cast %43 : i32 to index
        %c0_60 = arith.constant 0 : index
        %45 = vector.load %arg1[%44, %c0_60] : memref<32x32xbf16, #tpu.memory_space<vmem>>, vector<16x32xbf16>
        %cst = arith.constant dense<0.000000e+00> : vector<16x32xf32>
        %46 = tpu.matmul %45, %40, %cst {dimension_numbers = #tpu.dot_dimension_numbers<[1], [0], [0], [1], [0, 0, 1, 1], [], []>} : vector<16x32xbf16>, vector<32x32xbf16>, vector<16x32xf32> -> vector<16x32xf32>
        %47 = arith.addf %46, %39 : vector<16x32xf32>
        %48 = arith.index_cast %43 : i32 to index
        %c0_61 = arith.constant 0 : index
        %49 = vector.load %arg25[%48, %c0_61] : memref<32x32xf32, #tpu.memory_space<vmem>>, vector<16x32xf32>
        tpu.vector_store %arg25[%48, %c0_61], %47 {strides = array<i32>} : memref<32x32xf32, #tpu.memory_space<vmem>>, vector<16x32xf32>,
      }
      %c2_i32_59 = arith.constant 2 : i32
    } else {
    }
    %c0 = arith.constant 0 : index
    %c0_1 = arith.constant 0 : index
    %c0_2 = arith.constant 0 : index
    %3 = vector.load %arg4[%c0, %c0_1, %c0_2] : memref<1x1x32xf32, #tpu.memory_space<vmem>>, vector<1x1x32xf32>
    %4 = vector.shape_cast %3 : vector<1x1x32xf32> to vector<1x32xf32>
    %c0_3 = arith.constant 0 : index
    %c0_4 = arith.constant 0 : index
    %c0_5 = arith.constant 0 : index
    %5 = vector.load %arg5[%c0_3, %c0_4, %c0_5] : memref<1x1x32xf32, #tpu.memory_space<vmem>>, vector<1x1x32xf32>
    %6 = vector.shape_cast %5 : vector<1x1x32xf32> to vector<1x32xf32>
    %c0_6 = arith.constant 0 : index
    %c0_7 = arith.constant 0 : index
    %c0_8 = arith.constant 0 : index
    %7 = vector.load %arg14[%c0_6, %c0_7, %c0_8] : memref<1x1x32xf32, #tpu.memory_space<vmem>>, vector<1x1x32xf32>
    %8 = vector.shape_cast %7 : vector<1x1x32xf32> to vector<1x32xf32>
    %c0_9 = arith.constant 0 : index
    %c0_10 = arith.constant 0 : index
    %c0_11 = arith.constant 0 : index
    %9 = vector.load %arg15[%c0_9, %c0_10, %c0_11] : memref<1x1x32xf32, #tpu.memory_space<vmem>>, vector<1x1x32xf32>
    %10 = vector.shape_cast %9 : vector<1x1x32xf32> to vector<1x32xf32>
    %c0_12 = arith.constant 0 : index
    %c0_13 = arith.constant 0 : index
    %c0_14 = arith.constant 0 : index
    %11 = vector.load %arg6[%c0_12, %c0_13, %c0_14] : memref<1x32x32xbf16, #tpu.memory_space<vmem>>, vector<1x32x32xbf16>
    %12 = vector.shape_cast %11 : vector<1x32x32xbf16> to vector<32x32xbf16>
    %c0_15 = arith.constant 0 : index
    %c0_16 = arith.constant 0 : index
    %c0_17 = arith.constant 0 : index
    %13 = vector.load %arg7[%c0_15, %c0_16, %c0_17] : memref<1x1x32xf32, #tpu.memory_space<vmem>>, vector<1x1x32xf32>
    %14 = vector.shape_cast %13 : vector<1x1x32xf32> to vector<1x32xf32>
    %c0_18 = arith.constant 0 : index
    %c0_19 = arith.constant 0 : index
    %c0_20 = arith.constant 0 : index
    %15 = vector.load %arg8[%c0_18, %c0_19, %c0_20] : memref<1x32x32xbf16, #tpu.memory_space<vmem>>, vector<1x32x32xbf16>
    %16 = vector.shape_cast %15 : vector<1x32x32xbf16> to vector<32x32xbf16>
    %c0_21 = arith.constant 0 : index
    %c0_22 = arith.constant 0 : index
    %c0_23 = arith.constant 0 : index
    %17 = vector.load %arg9[%c0_21, %c0_22, %c0_23] : memref<1x1x32xf32, #tpu.memory_space<vmem>>, vector<1x1x32xf32>
    %18 = vector.shape_cast %17 : vector<1x1x32xf32> to vector<1x32xf32>
    %c0_24 = arith.constant 0 : index
    %c0_25 = arith.constant 0 : index
    %c0_26 = arith.constant 0 : index
    %19 = vector.load %arg10[%c0_24, %c0_25, %c0_26] : memref<1x32x32xbf16, #tpu.memory_space<vmem>>, vector<1x32x32xbf16>
    %20 = vector.shape_cast %19 : vector<1x32x32xbf16> to vector<32x32xbf16>
    %c0_27 = arith.constant 0 : index
    %c0_28 = arith.constant 0 : index
    %c0_29 = arith.constant 0 : index
    %21 = vector.load %arg11[%c0_27, %c0_28, %c0_29] : memref<1x1x32xf32, #tpu.memory_space<vmem>>, vector<1x1x32xf32>
    %22 = vector.shape_cast %21 : vector<1x1x32xf32> to vector<1x32xf32>
    %c0_30 = arith.constant 0 : index
    %c0_31 = arith.constant 0 : index
    %c0_32 = arith.constant 0 : index
    %23 = vector.load %arg12[%c0_30, %c0_31, %c0_32] : memref<1x32x32xbf16, #tpu.memory_space<vmem>>, vector<1x32x32xbf16>
    %24 = vector.shape_cast %23 : vector<1x32x32xbf16> to vector<32x32xbf16>
    %c0_33 = arith.constant 0 : index
    %c0_34 = arith.constant 0 : index
    %c0_35 = arith.constant 0 : index
    %25 = vector.load %arg13[%c0_33, %c0_34, %c0_35] : memref<1x1x32xf32, #tpu.memory_space<vmem>>, vector<1x1x32xf32>
    %26 = vector.shape_cast %25 : vector<1x1x32xf32> to vector<1x32xf32>
    %c0_36 = arith.constant 0 : index
    %c0_37 = arith.constant 0 : index
    %c0_38 = arith.constant 0 : index
    %27 = vector.load %arg16[%c0_36, %c0_37, %c0_38] : memref<1x32x128xbf16, #tpu.memory_space<vmem>>, vector<1x32x128xbf16>
    %28 = vector.shape_cast %27 : vector<1x32x128xbf16> to vector<32x128xbf16>
    %c0_39 = arith.constant 0 : index
    %c0_40 = arith.constant 0 : index
    %c0_41 = arith.constant 0 : index
    %29 = vector.load %arg17[%c0_39, %c0_40, %c0_41] : memref<1x1x128xf32, #tpu.memory_space<vmem>>, vector<1x1x128xf32>
    %30 = vector.shape_cast %29 : vector<1x1x128xf32> to vector<1x128xf32>
    %c0_42 = arith.constant 0 : index
    %c0_43 = arith.constant 0 : index
    %c0_44 = arith.constant 0 : index
    %31 = vector.load %arg18[%c0_42, %c0_43, %c0_44] : memref<1x128x32xbf16, #tpu.memory_space<vmem>>, vector<1x128x32xbf16>
    %32 = vector.shape_cast %31 : vector<1x128x32xbf16> to vector<128x32xbf16>
    %c0_45 = arith.constant 0 : index
    %c0_46 = arith.constant 0 : index
    %c0_47 = arith.constant 0 : index
    %33 = vector.load %arg19[%c0_45, %c0_46, %c0_47] : memref<1x1x32xf32, #tpu.memory_space<vmem>>, vector<1x1x32xf32>
    %34 = vector.shape_cast %33 : vector<1x1x32xf32> to vector<1x32xf32>
    %c0_i32_48 = arith.constant 0 : i32
    %c2_i32 = arith.constant 2 : i32
    %35 = arith.addi %c0_i32_48, %c2_i32 : i32
    %c1_i32 = arith.constant 1 : i32
    scf.for %arg26 = %c0_i32_48 to %35 step %c1_i32  : i32 {
      %c16_i32 = arith.constant 16 : i32
      %39 = arith.muli %arg26, %c16_i32 : i32
      %40 = tpu.assume_multiple %39, 16 : i32
      %41 = arith.index_cast %40 : i32 to index
      %c0_52 = arith.constant 0 : index
      %42 = vector.load %arg25[%41, %c0_52] : memref<32x32xf32, #tpu.memory_space<vmem>>, vector<16x32xf32>
      %cst = arith.constant dense<0.000000e+00> : vector<16xf32>
      %43 = vector.multi_reduction <add>, %42, %cst [1] : vector<16x32xf32> to vector<16xf32>
      %44 = vector.shape_cast %43 : vector<16xf32> to vector<16x1xf32>
      %cst_53 = arith.constant 3.200000e+01 : f32
      %45 = vector.broadcast %cst_53 : f32 to vector<16x1xf32>
      %46 = arith.divf %44, %45 : vector<16x1xf32>
      %47 = vector.broadcast %46 : vector<16x1xf32> to vector<16x32xf32>
      %48 = arith.subf %42, %47 : vector<16x32xf32>
      %49 = arith.mulf %48, %48 : vector<16x32xf32>
      %cst_54 = arith.constant dense<0.000000e+00> : vector<16xf32>
      %50 = vector.multi_reduction <add>, %49, %cst_54 [1] : vector<16x32xf32> to vector<16xf32>
      %51 = vector.shape_cast %50 : vector<16xf32> to vector<16x1xf32>
      %cst_55 = arith.constant 3.200000e+01 : f32
      %52 = vector.broadcast %cst_55 : f32 to vector<16x1xf32>
      %53 = arith.divf %51, %52 : vector<16x1xf32>
      %54 = vector.broadcast %46 : vector<16x1xf32> to vector<16x32xf32>
      %55 = arith.subf %42, %54 : vector<16x32xf32>
      %cst_56 = arith.constant 9.99999974E-6 : f32
      %56 = vector.broadcast %cst_56 : f32 to vector<16x1xf32>
      %57 = arith.addf %53, %56 : vector<16x1xf32>
      %58 = math.rsqrt %57 : vector<16x1xf32>
      %59 = vector.broadcast %58 : vector<16x1xf32> to vector<16x32xf32>
      %60 = arith.mulf %55, %59 : vector<16x32xf32>
      %61 = vector.broadcast %4 : vector<1x32xf32> to vector<16x32xf32>
      %62 = arith.mulf %60, %61 : vector<16x32xf32>
      %63 = vector.broadcast %6 : vector<1x32xf32> to vector<16x32xf32>
      %64 = arith.addf %62, %63 : vector<16x32xf32>
      %65 = arith.truncf %64 : vector<16x32xf32> to vector<16x32xbf16>
      %cst_57 = arith.constant dense<0.000000e+00> : vector<16x32xf32>
      %66 = tpu.matmul %65, %12, %cst_57 {dimension_numbers = #tpu.dot_dimension_numbers<[1], [0], [0], [1], [0, 0, 1, 1], [], []>} : vector<16x32xbf16>, vector<32x32xbf16>, vector<16x32xf32> -> vector<16x32xf32>
      %67 = vector.broadcast %14 : vector<1x32xf32> to vector<16x32xf32>
      %68 = arith.addf %66, %67 : vector<16x32xf32>
      %69 = arith.truncf %68 : vector<16x32xf32> to vector<16x32xbf16>
      %cst_58 = arith.constant dense<0.000000e+00> : vector<16x32xf32>
      %70 = tpu.matmul %65, %16, %cst_58 {dimension_numbers = #tpu.dot_dimension_numbers<[1], [0], [0], [1], [0, 0, 1, 1], [], []>} : vector<16x32xbf16>, vector<32x32xbf16>, vector<16x32xf32> -> vector<16x32xf32>
      %71 = vector.broadcast %18 : vector<1x32xf32> to vector<16x32xf32>
      %72 = arith.addf %70, %71 : vector<16x32xf32>
      %73 = arith.truncf %72 : vector<16x32xf32> to vector<16x32xbf16>
      %cst_59 = arith.constant dense<0.000000e+00> : vector<16x32xf32>
      %74 = tpu.matmul %65, %20, %cst_59 {dimension_numbers = #tpu.dot_dimension_numbers<[1], [0], [0], [1], [0, 0, 1, 1], [], []>} : vector<16x32xbf16>, vector<32x32xbf16>, vector<16x32xf32> -> vector<16x32xf32>
      %75 = vector.broadcast %22 : vector<1x32xf32> to vector<16x32xf32>
      %76 = arith.addf %74, %75 : vector<16x32xf32>
      %77 = arith.truncf %76 : vector<16x32xf32> to vector<16x32xbf16>
      %78 = vector.extract_strided_slice %69 {offsets = [0, 0], sizes = [16, 16], strides = [1, 1]} : vector<16x32xbf16> to vector<16x16xbf16>
      %79 = vector.extract_strided_slice %73 {offsets = [0, 0], sizes = [16, 16], strides = [1, 1]} : vector<16x32xbf16> to vector<16x16xbf16>
      %80 = vector.extract_strided_slice %77 {offsets = [0, 0], sizes = [16, 16], strides = [1, 1]} : vector<16x32xbf16> to vector<16x16xbf16>
      "tpu.trace_start"() <{level = 10 : i32, message = "qd,kd->qk"}> : () -> ()
      %cst_60 = arith.constant dense<0.000000e+00> : vector<16x16xf32>
      %81 = tpu.matmul %78, %79, %cst_60 {dimension_numbers = #tpu.dot_dimension_numbers<[1], [1], [0], [0], [0, 0, 1, 0], [], []>} : vector<16x16xbf16>, vector<16x16xbf16>, vector<16x16xf32> -> vector<16x16xf32>
      "tpu.trace_stop"() : () -> ()
      %cst_61 = arith.constant 2.500000e-01 : f32
      %82 = vector.broadcast %cst_61 : f32 to vector<16x16xf32>
      %83 = arith.mulf %81, %82 : vector<16x16xf32>
      %cst_62 = arith.constant dense<0xFF800000> : vector<16xf32>
      %84 = vector.multi_reduction <maximumf>, %83, %cst_62 [1] : vector<16x16xf32> to vector<16xf32>
      %85 = vector.shape_cast %84 : vector<16xf32> to vector<16x1xf32>
      %86 = vector.broadcast %85 : vector<16x1xf32> to vector<16x16xf32>
      %87 = arith.subf %83, %86 : vector<16x16xf32>
      %88 = math.exp %87 : vector<16x16xf32>
      %cst_63 = arith.constant dense<0.000000e+00> : vector<16xf32>
      %89 = vector.multi_reduction <add>, %88, %cst_63 [1] : vector<16x16xf32> to vector<16xf32>
      %90 = vector.shape_cast %89 : vector<16xf32> to vector<16x1xf32>
      %91 = vector.broadcast %90 : vector<16x1xf32> to vector<16x16xf32>
      %92 = arith.divf %88, %91 : vector<16x16xf32>
      %93 = arith.truncf %92 : vector<16x16xf32> to vector<16x16xbf16>
      %cst_64 = arith.constant dense<0.000000e+00> : vector<16x16xf32>
      %94 = tpu.matmul %93, %80, %cst_64 {dimension_numbers = #tpu.dot_dimension_numbers<[1], [0], [0], [1], [0, 0, 1, 1], [], []>} : vector<16x16xbf16>, vector<16x16xbf16>, vector<16x16xf32> -> vector<16x16xf32>
      %95 = arith.truncf %94 : vector<16x16xf32> to vector<16x16xbf16>
      %96 = vector.extract_strided_slice %69 {offsets = [0, 16], sizes = [16, 16], strides = [1, 1]} : vector<16x32xbf16> to vector<16x16xbf16>
      %97 = vector.extract_strided_slice %73 {offsets = [0, 16], sizes = [16, 16], strides = [1, 1]} : vector<16x32xbf16> to vector<16x16xbf16>
      %98 = vector.extract_strided_slice %77 {offsets = [0, 16], sizes = [16, 16], strides = [1, 1]} : vector<16x32xbf16> to vector<16x16xbf16>
      "tpu.trace_start"() <{level = 10 : i32, message = "qd,kd->qk"}> : () -> ()
      %cst_65 = arith.constant dense<0.000000e+00> : vector<16x16xf32>
      %99 = tpu.matmul %96, %97, %cst_65 {dimension_numbers = #tpu.dot_dimension_numbers<[1], [1], [0], [0], [0, 0, 1, 0], [], []>} : vector<16x16xbf16>, vector<16x16xbf16>, vector<16x16xf32> -> vector<16x16xf32>
      "tpu.trace_stop"() : () -> ()
      %cst_66 = arith.constant 2.500000e-01 : f32
      %100 = vector.broadcast %cst_66 : f32 to vector<16x16xf32>
      %101 = arith.mulf %99, %100 : vector<16x16xf32>
      %cst_67 = arith.constant dense<0xFF800000> : vector<16xf32>
      %102 = vector.multi_reduction <maximumf>, %101, %cst_67 [1] : vector<16x16xf32> to vector<16xf32>
      %103 = vector.shape_cast %102 : vector<16xf32> to vector<16x1xf32>
      %104 = vector.broadcast %103 : vector<16x1xf32> to vector<16x16xf32>
      %105 = arith.subf %101, %104 : vector<16x16xf32>
      %106 = math.exp %105 : vector<16x16xf32>
      %cst_68 = arith.constant dense<0.000000e+00> : vector<16xf32>
      %107 = vector.multi_reduction <add>, %106, %cst_68 [1] : vector<16x16xf32> to vector<16xf32>
      %108 = vector.shape_cast %107 : vector<16xf32> to vector<16x1xf32>
      %109 = vector.broadcast %108 : vector<16x1xf32> to vector<16x16xf32>
      %110 = arith.divf %106, %109 : vector<16x16xf32>
      %111 = arith.truncf %110 : vector<16x16xf32> to vector<16x16xbf16>
      %cst_69 = arith.constant dense<0.000000e+00> : vector<16x16xf32>
      %112 = tpu.matmul %111, %98, %cst_69 {dimension_numbers = #tpu.dot_dimension_numbers<[1], [0], [0], [1], [0, 0, 1, 1], [], []>} : vector<16x16xbf16>, vector<16x16xbf16>, vector<16x16xf32> -> vector<16x16xf32>
      %113 = arith.truncf %112 : vector<16x16xf32> to vector<16x16xbf16>
      %114 = tpu.concatenate %95, %113 in 1 : vector<16x16xbf16>, vector<16x16xbf16> -> vector<16x32xbf16>
      %cst_70 = arith.constant dense<0.000000e+00> : vector<16x32xf32>
      %115 = tpu.matmul %114, %24, %cst_70 {dimension_numbers = #tpu.dot_dimension_numbers<[1], [0], [0], [1], [0, 0, 1, 1], [], []>} : vector<16x32xbf16>, vector<32x32xbf16>, vector<16x32xf32> -> vector<16x32xf32>
      %116 = arith.addf %42, %115 : vector<16x32xf32>
      %117 = vector.broadcast %26 : vector<1x32xf32> to vector<16x32xf32>
      %118 = arith.addf %116, %117 : vector<16x32xf32>
      %cst_71 = arith.constant dense<0.000000e+00> : vector<16xf32>
      %119 = vector.multi_reduction <add>, %118, %cst_71 [1] : vector<16x32xf32> to vector<16xf32>
      %120 = vector.shape_cast %119 : vector<16xf32> to vector<16x1xf32>
      %cst_72 = arith.constant 3.200000e+01 : f32
      %121 = vector.broadcast %cst_72 : f32 to vector<16x1xf32>
      %122 = arith.divf %120, %121 : vector<16x1xf32>
      %123 = vector.broadcast %122 : vector<16x1xf32> to vector<16x32xf32>
      %124 = arith.subf %118, %123 : vector<16x32xf32>
      %125 = arith.mulf %124, %124 : vector<16x32xf32>
      %cst_73 = arith.constant dense<0.000000e+00> : vector<16xf32>
      %126 = vector.multi_reduction <add>, %125, %cst_73 [1] : vector<16x32xf32> to vector<16xf32>
      %127 = vector.shape_cast %126 : vector<16xf32> to vector<16x1xf32>
      %cst_74 = arith.constant 3.200000e+01 : f32
      %128 = vector.broadcast %cst_74 : f32 to vector<16x1xf32>
      %129 = arith.divf %127, %128 : vector<16x1xf32>
      %130 = vector.broadcast %122 : vector<16x1xf32> to vector<16x32xf32>
      %131 = arith.subf %118, %130 : vector<16x32xf32>
      %cst_75 = arith.constant 9.99999974E-6 : f32
      %132 = vector.broadcast %cst_75 : f32 to vector<16x1xf32>
      %133 = arith.addf %129, %132 : vector<16x1xf32>
      %134 = math.rsqrt %133 : vector<16x1xf32>
      %135 = vector.broadcast %134 : vector<16x1xf32> to vector<16x32xf32>
      %136 = arith.mulf %131, %135 : vector<16x32xf32>
      %137 = vector.broadcast %8 : vector<1x32xf32> to vector<16x32xf32>
      %138 = arith.mulf %136, %137 : vector<16x32xf32>
      %139 = vector.broadcast %10 : vector<1x32xf32> to vector<16x32xf32>
      %140 = arith.addf %138, %139 : vector<16x32xf32>
      %141 = arith.truncf %140 : vector<16x32xf32> to vector<16x32xbf16>
      %cst_76 = arith.constant dense<0.000000e+00> : vector<16x128xf32>
      %142 = tpu.matmul %141, %28, %cst_76 {dimension_numbers = #tpu.dot_dimension_numbers<[1], [0], [0], [1], [0, 0, 1, 1], [], []>} : vector<16x32xbf16>, vector<32x128xbf16>, vector<16x128xf32> -> vector<16x128xf32>
      %143 = vector.broadcast %30 : vector<1x128xf32> to vector<16x128xf32>
      %144 = arith.addf %142, %143 : vector<16x128xf32>
      %cst_77 = arith.constant 0.000000e+00 : f32
      %145 = vector.broadcast %cst_77 : f32 to vector<16x128xf32>
      %146 = arith.maximumf %144, %145 : vector<16x128xf32>
      %147 = arith.truncf %146 : vector<16x128xf32> to vector<16x128xbf16>
      %cst_78 = arith.constant dense<0.000000e+00> : vector<16x32xf32>
      %148 = tpu.matmul %147, %32, %cst_78 {dimension_numbers = #tpu.dot_dimension_numbers<[1], [0], [0], [1], [0, 0, 1, 1], [], []>} : vector<16x128xbf16>, vector<128x32xbf16>, vector<16x32xf32> -> vector<16x32xf32>
      %149 = arith.addf %118, %148 : vector<16x32xf32>
      %150 = vector.broadcast %34 : vector<1x32xf32> to vector<16x32xf32>
      %151 = arith.addf %149, %150 : vector<16x32xf32>
      %152 = arith.index_cast %40 : i32 to index
      %c0_79 = arith.constant 0 : index
      %153 = vector.load %arg25[%152, %c0_79] : memref<32x32xf32, #tpu.memory_space<vmem>>, vector<16x32xf32>
      tpu.vector_store %arg25[%152, %c0_79], %151 {strides = array<i32>} : memref<32x32xf32, #tpu.memory_space<vmem>>, vector<16x32xf32>,
    }
    %c2_i32_49 = arith.constant 2 : i32
    %c1_i32_50 = arith.constant 1 : i32
    %36 = arith.cmpi eq, %arg0, %c1_i32_50 : i32
    %37 = arith.extui %36 : i1 to i32
    %c0_i32_51 = arith.constant 0 : i32
    %38 = arith.cmpi ne, %37, %c0_i32_51 : i32
    scf.if %38 {
      %c0_52 = arith.constant 0 : index
      %c0_53 = arith.constant 0 : index
      %39 = vector.load %arg20[%c0_52, %c0_53] : memref<1x32xf32, #tpu.memory_space<vmem>>, vector<1x32xf32>
      %c0_54 = arith.constant 0 : index
      %c0_55 = arith.constant 0 : index
      %40 = vector.load %arg21[%c0_54, %c0_55] : memref<1x32xf32, #tpu.memory_space<vmem>>, vector<1x32xf32>
      %c0_56 = arith.constant 0 : index
      %c0_57 = arith.constant 0 : index
      %41 = vector.load %arg22[%c0_56, %c0_57] : memref<32x128xbf16, #tpu.memory_space<vmem>>, vector<32x128xbf16>
      %c0_58 = arith.constant 0 : index
      %c0_59 = arith.constant 0 : index
      %42 = vector.load %arg23[%c0_58, %c0_59] : memref<1x128xf32, #tpu.memory_space<vmem>>, vector<1x128xf32>
      %c0_i32_60 = arith.constant 0 : i32
      %c2_i32_61 = arith.constant 2 : i32
      %43 = arith.addi %c0_i32_60, %c2_i32_61 : i32
      %c1_i32_62 = arith.constant 1 : i32
      scf.for %arg26 = %c0_i32_60 to %43 step %c1_i32_62  : i32 {
        %c16_i32 = arith.constant 16 : i32
        %44 = arith.muli %arg26, %c16_i32 : i32
        %45 = tpu.assume_multiple %44, 16 : i32
        %46 = arith.index_cast %45 : i32 to index
        %c0_64 = arith.constant 0 : index
        %47 = vector.load %arg25[%46, %c0_64] : memref<32x32xf32, #tpu.memory_space<vmem>>, vector<16x32xf32>
        %cst = arith.constant dense<0.000000e+00> : vector<16xf32>
        %48 = vector.multi_reduction <add>, %47, %cst [1] : vector<16x32xf32> to vector<16xf32>
        %49 = vector.shape_cast %48 : vector<16xf32> to vector<16x1xf32>
        %cst_65 = arith.constant 3.200000e+01 : f32
        %50 = vector.broadcast %cst_65 : f32 to vector<16x1xf32>
        %51 = arith.divf %49, %50 : vector<16x1xf32>
        %52 = vector.broadcast %51 : vector<16x1xf32> to vector<16x32xf32>
        %53 = arith.subf %47, %52 : vector<16x32xf32>
        %54 = arith.mulf %53, %53 : vector<16x32xf32>
        %cst_66 = arith.constant dense<0.000000e+00> : vector<16xf32>
        %55 = vector.multi_reduction <add>, %54, %cst_66 [1] : vector<16x32xf32> to vector<16xf32>
        %56 = vector.shape_cast %55 : vector<16xf32> to vector<16x1xf32>
        %cst_67 = arith.constant 3.200000e+01 : f32
        %57 = vector.broadcast %cst_67 : f32 to vector<16x1xf32>
        %58 = arith.divf %56, %57 : vector<16x1xf32>
        %59 = vector.broadcast %51 : vector<16x1xf32> to vector<16x32xf32>
        %60 = arith.subf %47, %59 : vector<16x32xf32>
        %cst_68 = arith.constant 9.99999974E-6 : f32
        %61 = vector.broadcast %cst_68 : f32 to vector<16x1xf32>
        %62 = arith.addf %58, %61 : vector<16x1xf32>
        %63 = math.rsqrt %62 : vector<16x1xf32>
        %64 = vector.broadcast %63 : vector<16x1xf32> to vector<16x32xf32>
        %65 = arith.mulf %60, %64 : vector<16x32xf32>
        %66 = vector.broadcast %39 : vector<1x32xf32> to vector<16x32xf32>
        %67 = arith.mulf %65, %66 : vector<16x32xf32>
        %68 = vector.broadcast %40 : vector<1x32xf32> to vector<16x32xf32>
        %69 = arith.addf %67, %68 : vector<16x32xf32>
        %70 = arith.truncf %69 : vector<16x32xf32> to vector<16x32xbf16>
        %cst_69 = arith.constant dense<0.000000e+00> : vector<16x128xf32>
        %71 = tpu.matmul %70, %41, %cst_69 {dimension_numbers = #tpu.dot_dimension_numbers<[1], [0], [0], [1], [0, 0, 1, 1], [], []>} : vector<16x32xbf16>, vector<32x128xbf16>, vector<16x128xf32> -> vector<16x128xf32>
        %72 = vector.broadcast %42 : vector<1x128xf32> to vector<16x128xf32>
        %73 = arith.addf %71, %72 : vector<16x128xf32>
        %74 = arith.index_cast %45 : i32 to index
        %c0_70 = arith.constant 0 : index
        %75 = vector.load %arg24[%74, %c0_70] : memref<32x128xf32, #tpu.memory_space<vmem>>, vector<16x128xf32>
        tpu.vector_store %arg24[%74, %c0_70], %73 {strides = array<i32>} : memref<32x128xf32, #tpu.memory_space<vmem>>, vector<16x128xf32>,
      }
      %c2_i32_63 = arith.constant 2 : i32
    } else {
    }
    return
  }
  func.func @transform_0(%arg0: i32) -> (i32, i32) {
    %c0_i32 = arith.constant 0 : i32
    %c0_i32_0 = arith.constant 0 : i32
    %c0_i32_1 = arith.constant 0 : i32
    return %c0_i32, %c0_i32_0 : i32, i32
  }
  func.func @transform_1(%arg0: i32) -> (i32, i32) {
    %c0_i32 = arith.constant 0 : i32
    %c0_i32_0 = arith.constant 0 : i32
    %c0_i32_1 = arith.constant 0 : i32
    return %c0_i32, %c0_i32_0 : i32, i32
  }
  func.func @transform_2(%arg0: i32) -> (i32, i32) {
    %c0_i32 = arith.constant 0 : i32
    %c0_i32_0 = arith.constant 0 : i32
    %c0_i32_1 = arith.constant 0 : i32
    return %c0_i32, %c0_i32_0 : i32, i32
  }
  func.func @transform_3(%arg0: i32) -> (i32, i32, i32) {
    %c0_i32 = arith.constant 0 : i32
    %c0_i32_0 = arith.constant 0 : i32
    %c0_i32_1 = arith.constant 0 : i32
    return %arg0, %c0_i32, %c0_i32_0 : i32, i32, i32
  }
  func.func @transform_4(%arg0: i32) -> (i32, i32, i32) {
    %c0_i32 = arith.constant 0 : i32
    %c0_i32_0 = arith.constant 0 : i32
    %c0_i32_1 = arith.constant 0 : i32
    return %arg0, %c0_i32, %c0_i32_0 : i32, i32, i32
  }
  func.func @transform_5(%arg0: i32) -> (i32, i32, i32) {
    %c0_i32 = arith.constant 0 : i32
    %c0_i32_0 = arith.constant 0 : i32
    %c0_i32_1 = arith.constant 0 : i32
    return %arg0, %c0_i32, %c0_i32_0 : i32, i32, i32
  }
  func.func @transform_6(%arg0: i32) -> (i32, i32, i32) {
    %c0_i32 = arith.constant 0 : i32
    %c0_i32_0 = arith.constant 0 : i32
    %c0_i32_1 = arith.constant 0 : i32
    return %arg0, %c0_i32, %c0_i32_0 : i32, i32, i32
  }
  func.func @transform_7(%arg0: i32) -> (i32, i32, i32) {
    %c0_i32 = arith.constant 0 : i32
    %c0_i32_0 = arith.constant 0 : i32
    %c0_i32_1 = arith.constant 0 : i32
    return %arg0, %c0_i32, %c0_i32_0 : i32, i32, i32
  }
  func.func @transform_8(%arg0: i32) -> (i32, i32, i32) {
    %c0_i32 = arith.constant 0 : i32
    %c0_i32_0 = arith.constant 0 : i32
    %c0_i32_1 = arith.constant 0 : i32
    return %arg0, %c0_i32, %c0_i32_0 : i32, i32, i32
  }
  func.func @transform_9(%arg0: i32) -> (i32, i32, i32) {
    %c0_i32 = arith.constant 0 : i32
    %c0_i32_0 = arith.constant 0 : i32
    %c0_i32_1 = arith.constant 0 : i32
    return %arg0, %c0_i32, %c0_i32_0 : i32, i32, i32
  }
  func.func @transform_10(%arg0: i32) -> (i32, i32, i32) {
    %c0_i32 = arith.constant 0 : i32
    %c0_i32_0 = arith.constant 0 : i32
    %c0_i32_1 = arith.constant 0 : i32
    return %arg0, %c0_i32, %c0_i32_0 : i32, i32, i32
  }
  func.func @transform_11(%arg0: i32) -> (i32, i32, i32) {
    %c0_i32 = arith.constant 0 : i32
    %c0_i32_0 = arith.constant 0 : i32
    %c0_i32_1 = arith.constant 0 : i32
    return %arg0, %c0_i32, %c0_i32_0 : i32, i32, i32
  }
  func.func @transform_12(%arg0: i32) -> (i32, i32, i32) {
    %c0_i32 = arith.constant 0 : i32
    %c0_i32_0 = arith.constant 0 : i32
    %c0_i32_1 = arith.constant 0 : i32
    return %arg0, %c0_i32, %c0_i32_0 : i32, i32, i32
  }
  func.func @transform_13(%arg0: i32) -> (i32, i32, i32) {
    %c0_i32 = arith.constant 0 : i32
    %c0_i32_0 = arith.constant 0 : i32
    %c0_i32_1 = arith.constant 0 : i32
    return %arg0, %c0_i32, %c0_i32_0 : i32, i32, i32
  }
  func.func @transform_14(%arg0: i32) -> (i32, i32, i32) {
    %c0_i32 = arith.constant 0 : i32
    %c0_i32_0 = arith.constant 0 : i32
    %c0_i32_1 = arith.constant 0 : i32
    return %arg0, %c0_i32, %c0_i32_0 : i32, i32, i32
  }
  func.func @transform_15(%arg0: i32) -> (i32, i32, i32) {
    %c0_i32 = arith.constant 0 : i32
    %c0_i32_0 = arith.constant 0 : i32
    %c0_i32_1 = arith.constant 0 : i32
    return %arg0, %c0_i32, %c0_i32_0 : i32, i32, i32
  }
  func.func @transform_16(%arg0: i32) -> (i32, i32, i32) {
    %c0_i32 = arith.constant 0 : i32
    %c0_i32_0 = arith.constant 0 : i32
    %c0_i32_1 = arith.constant 0 : i32
    return %arg0, %c0_i32, %c0_i32_0 : i32, i32, i32
  }
  func.func @transform_17(%arg0: i32) -> (i32, i32, i32) {
    %c0_i32 = arith.constant 0 : i32
    %c0_i32_0 = arith.constant 0 : i32
    %c0_i32_1 = arith.constant 0 : i32
    return %arg0, %c0_i32, %c0_i32_0 : i32, i32, i32
  }
  func.func @transform_18(%arg0: i32) -> (i32, i32, i32) {
    %c0_i32 = arith.constant 0 : i32
    %c0_i32_0 = arith.constant 0 : i32
    %c0_i32_1 = arith.constant 0 : i32
    return %arg0, %c0_i32, %c0_i32_0 : i32, i32, i32
  }
  func.func @transform_19(%arg0: i32) -> (i32, i32) {
    %c0_i32 = arith.constant 0 : i32
    %c0_i32_0 = arith.constant 0 : i32
    %c0_i32_1 = arith.constant 0 : i32
    return %c0_i32, %c0_i32_0 : i32, i32
  }
  func.func @transform_20(%arg0: i32) -> (i32, i32) {
    %c0_i32 = arith.constant 0 : i32
    %c0_i32_0 = arith.constant 0 : i32
    %c0_i32_1 = arith.constant 0 : i32
    return %c0_i32, %c0_i32_0 : i32, i32
  }
  func.func @transform_21(%arg0: i32) -> (i32, i32) {
    %c0_i32 = arith.constant 0 : i32
    %c0_i32_0 = arith.constant 0 : i32
    %c0_i32_1 = arith.constant 0 : i32
    return %c0_i32, %c0_i32_0 : i32, i32
  }
  func.func @transform_22(%arg0: i32) -> (i32, i32) {
    %c0_i32 = arith.constant 0 : i32
    %c0_i32_0 = arith.constant 0 : i32
    %c0_i32_1 = arith.constant 0 : i32
    return %c0_i32, %c0_i32_0 : i32, i32
  }
  func.func @transform_23(%arg0: i32) -> (i32, i32) {
    %c0_i32 = arith.constant 0 : i32
    %c0_i32_0 = arith.constant 0 : i32
    %c0_i32_1 = arith.constant 0 : i32
    return %c0_i32, %c0_i32_0 : i32, i32
  }
}

</mosaic_0001>

<bundles_post_ra>
// kernel: tpu_custom_call.1
= control target key start
LH: loop header
LB: loop body
LE: loop exit
PB: predicated region body
PF: predicated region fallthrough
CT: control target
= control target key end

     0   :  { %s5407_s0 = inlined_call_operand.hbm [shape: bf16[32,32], index: 0, kind: input, shape index: {}]   ;;  %s5408_s1 = inlined_call_operand.hbm [shape: bf16[32,32], index: 1, kind: input, shape index: {}]   ;;  %s5409_s2 = inlined_call_operand.hbm [shape: f32[16,32], index: 2, kind: input, shape index: {}]   ;;  %s5410_s3 = inlined_call_operand.hbm [shape: f32[2,1,32], index: 3, kind: input, shape index: {}]   ;;  %s5411_s4 = inlined_call_operand.hbm [shape: f32[2,1,32], index: 4, kind: input, shape index: {}]   ;;  %s5412_s5 = inlined_call_operand.hbm [shape: bf16[2,32,32], index: 5, kind: input, shape index: {}]   ;;  %s5413_s6 = inlined_call_operand.hbm [shape: f32[2,1,32], index: 6, kind: input, shape index: {}]   ;;  %s5414_s7 = inlined_call_operand.hbm [shape: bf16[2,32,32], index: 7, kind: input, shape index: {}]   ;;  %s5415_s8 = inlined_call_operand.hbm [shape: f32[2,1,32], index: 8, kind: input, shape index: {}]   ;;  %s5416_s9 = inlined_call_operand.hbm [shape: bf16[2,32,32], index: 9, kind: input, shape index: {}]   ;;  %s5417_s10 = inlined_call_operand.hbm [shape: f32[2,1,32], index: 10, kind: input, shape index: {}]   ;;  %s5418_s11 = inlined_call_operand.hbm [shape: bf16[2,32,32], index: 11, kind: input, shape index: {}]   ;;  %s5419_s12 = inlined_call_operand.hbm [shape: f32[2,1,32], index: 12, kind: input, shape index: {}]   ;;  %s5420_s13 = inlined_call_operand.hbm [shape: f32[2,1,32], index: 13, kind: input, shape index: {}]   ;;  %s5421_s14 = inlined_call_operand.hbm [shape: f32[2,1,32], index: 14, kind: input, shape index: {}]   ;;  %s5422_s15 = inlined_call_operand.hbm [shape: bf16[2,32,128], index: 15, kind: input, shape index: {}]   ;;  %s5423_s16 = inlined_call_operand.hbm [shape: f32[2,1,128], index: 16, kind: input, shape index: {}]   ;;  %s5424_s17 = inlined_call_operand.hbm [shape: bf16[2,128,32], index: 17, kind: input, shape index: {}]   ;;  %s5425_s18 = inlined_call_operand.hbm [shape: f32[2,1,32], index: 18, kind: input, shape index: {}]   ;;  %s5426_s19 = inlined_call_operand.hbm [shape: f32[1,32], index: 19, kind: input, shape index: {}]   ;;  %s5427_s20 = inlined_call_operand.hbm [shape: f32[1,32], index: 20, kind: input, shape index: {}]   ;;  %s5428_s21 = inlined_call_operand.hbm [shape: bf16[32,128], index: 21, kind: input, shape index: {}]   ;;  %s5429_s22 = inlined_call_operand.hbm [shape: f32[1,128], index: 22, kind: input, shape index: {}]   ;;  %s5430_s23 = inlined_call_operand.hbm [shape: f32[32,128], index: 23, kind: output, shape index: {}]  }
   0x1   :  { %5475 = sst [smem:[#allocation64_spill]] %s5407_s0 }
   0x2   :  { %5476 = sst [smem:[#allocation65_spill]] %s5408_s1 }
   0x3   :  { %5477 = sst [smem:[#allocation66_spill]] %s5409_s2 }
   0x4   :  { %5478 = sst [smem:[#allocation67_spill]] %s5410_s3 }
   0x5   :  { %5479 = sst [smem:[#allocation68_spill]] %s5411_s4 }
   0x6   :  { %5480 = sst [smem:[#allocation69_spill]] %s5412_s5 }
   0x7   :  { %5481 = sst [smem:[#allocation70_spill]] %s5413_s6 }
   0x8   :  { %5482 = sst [smem:[#allocation71_spill]] %s5414_s7 }
   0x9   :  { %5483 = sst [smem:[#allocation72_spill]] %s5415_s8 }
   0xa   :  { %5484 = sst [smem:[#allocation73_spill]] %s5419_s12 }
   0xb   :  { %5485 = sst [smem:[#allocation74_spill]] %s5421_s14 }
   0xc   :  { %5486 = sst [smem:[#allocation75_spill]] %s5423_s16 }
   0xd   :  { %5487 = sst [smem:[#allocation76_spill]] %s5425_s18 }
   0xe   :  { %5488 = sst [smem:[#allocation77_spill]] %s5426_s19 }
   0xf   :  { %5489 = sst [smem:[#allocation78_spill]] %s5427_s20 }
  0x10   :  { %5490 = sst [smem:[#allocation79_spill]] %s5428_s21 }
  0x11   :  { %5491 = sst [smem:[#allocation80_spill]] %s5430_s23 }
  0x12   :  { %28 = vsyncpa [#allocation4], 0 }
  0x13   :  { %29 = vsyncpa [#allocation7], 0 }
  0x14   :  { %30 = vsyncpa [#allocation10], 0 }
  0x15   :  { %32 = vsyncpa [#allocation10 + $0x1], 0 }
  0x16   :  { %33 = vsyncpa [#allocation13], 0 }
  0x17   :  { %35 = vsyncpa [#allocation13 + $0x1], 0 }
  0x18   :  { %36 = vsyncpa [#allocation16], 0 }
  0x19   :  { %38 = vsyncpa [#allocation16 + $0x1], 0 }
  0x1a   :  { %39 = vsyncpa [#allocation19], 0 }
  0x1b   :  { %41 = vsyncpa [#allocation19 + $0x1], 0 }
  0x1c   :  { %42 = vsyncpa [#allocation22], 0 }
  0x1d   :  { %44 = vsyncpa [#allocation22 + $0x1], 0 }
  0x1e   :  { %45 = vsyncpa [#allocation25], 0 }
  0x1f   :  { %47 = vsyncpa [#allocation25 + $0x1], 0 }
  0x20   :  { %48 = vsyncpa [#allocation28], 0 }
  0x21   :  { %50 = vsyncpa [#allocation28 + $0x1], 0 }
  0x22   :  { %51 = vsyncpa [#allocation31], 0 }
  0x23   :  { %53 = vsyncpa [#allocation31 + $0x1], 0 }
  0x24   :  { %54 = vsyncpa [#allocation34], 0 }
  0x25   :  { %55 = vsyncpa [#allocation37], 0 }
  0x26   :  { %56 = vsyncpa [#allocation5], 0  ;;  %s4204_s4 = smov 0   ;;  %s4206_s30 = smov 0  }
  0x27   :  { %s4208_s24 = smov 0   ;;  %s4210_s25 = smov 0  }
  0x28 LB: > { %5492 = sst [smem:[#allocation53_spill]] %s4022_s30  ;;  %s4223_s5 = sadd.s32 4294967295, %s4030_s25   ;;  %s4030_s25 = sphi %s4210_s25, %s5566_s25   ;;  %s4026_s24 = sphi %s4208_s24, %s5570_s24   ;;  %s4022_s30 = sphi %s4206_s30, %s5569_s30   ;;  %s4018_s4 = sphi %s4204_s4, %s5567_s4  }
  0x29   : > { %5493 = sst [smem:[#allocation54_spill]] %s4223_s5  ;;  %s4226_s1 = sadd.s32 1, %s4030_s25  }
  0x2a   : > { %5494 = sst [smem:[#allocation55_spill]] %s4226_s1  ;;  %s129_s26 = ssub.s32 %s4030_s25, %s4226_s1 }
  0x2b   : > { %s132_s2 = sadd.s32 1, %s4026_s24  ;;  %p130_p0 = scmp.eq.s32.totalorder %s129_s26, 0 }
  0x2c   : > { %p139_p1 = scmp.ne.s32.totalorder %s4026_s24, %s4022_s30  ;;  %p140_p2 = scmp.eq.s32.totalorder %s4030_s25, 0 }
  0x2d   : > { %p145_p3 = scmp.ne.s32.totalorder %s4022_s30, %s4018_s4  ;;  %p5449_p5 = scmp.eq.s32.totalorder %s4223_s5, 0 }
  0x2e   : > { %s4236_s6 = scalar_select %p130_p0, %s4026_s24, %s132_s2  }
  0x2f   : > { %p4238_p4 = por %p140_p2, %p139_p1  ;;  %p2803_p6 = scmp.ge.s32.totalorder %s4030_s25, 1 }
  0x30   : > { %5495 = sst [smem:[#allocation56_spill]] %s4236_s6  ;;  %p651_p7 = scmp.lt.s32.totalorder %s4030_s25, 3 }
  0x31   : > { %s5496_s27 = scalar_select %p4238_p4, 1, 0 }
  0x32   : > { %p4247_p8 = por %p5449_p5, %p145_p3  ;;  %p4252_p10 = pnand %p2803_p6, %p651_p7 }
  0x33   : > { %s4044_s29 = smov [#allocation6]   ;;  %s4045_s4 = smov [#allocation33]  }
  0x34   : > { %s5497_s7 = scalar_select %p4247_p8, 1, 0 }
  0x35   : > { %s5499_s28 = scalar_select %p4252_p10, 1, 0 }
  0x36   : > { %5498 = sst [smem:[#allocation57_spill]] %s5497_s7  ;;  %p3119_p11 = pneg %p4252_p10 }
  0x37   : > { %5500 = sst [smem:[#allocation58_spill]] %s5499_s28  ;;  %s676_s3 = sshll.u32 %s4044_s29, 4  ;;  %s4258_s3 = int_to_ptr.vmem [resolvable:$true] %s676_s3 }
  0x38   : > { %p4262_p12 = pnand %p3119_p11, %p5449_p5  ;;  %s703_s26 = sshll.u32 %s4045_s4, 4  ;;  %s4266_s26 = int_to_ptr.vmem [resolvable:$true] %s703_s26 }
  0x39   : > { %s4046_s2 = smov [#allocation36]   ;;  %s5502_s7 = sld [smem:[#allocation65_spill]] }
  0x3a   : > { %s4268_s6 = sshll.u32 %s4046_s2, 4  ;;  %p4278_p0 = pneg %p4262_p12  ;;  %s725_s6 = int_to_ptr.vmem [resolvable:$true] %s4268_s6 }
  0x3f   : > { %s3266_s30 = scalar_lea.hbm %s5502_s7, 256 }
  0x40   : > { %p3267_p13 = scmp.ne.s32.totalorder %s5502_s7, %s3266_s30  ;;  %p3273_p3 = scmp.lt.u32.totalorder %s3266_s30, %s5502_s7 }
  0x42   : > { %p3269_p1 = pnand %p4278_p0, %p3267_p13 }
  0x44   : > { %p3270_p2 = pneg %p3269_p1 }
  0x46   : > { %p3275_p6 = pnand %p3273_p3, %p3270_p2 }
  0x48   : > { %3278 = shalt.err (!%p3275_p6)
}
  0x49   : > { %s3279_s23 = scalar_lea.vmem %s4258_s3, 256  ;;  %p3287_p5 = scmp.lt.s32.totalorder %s4258_s3, %s4258_s3 }
  0x4a   : > { %p3280_p7 = scmp.ne.s32.totalorder %s4258_s3, %s3279_s23  ;;  %p3288_p8 = scmp.lt.s32.totalorder %s3279_s23, %s3279_s23 }
  0x4c   : > { %p3282_p11 = pnand %p3280_p7, %p4278_p0  ;;  %p3289_p13 = por %p3288_p8, %p3287_p5 }
  0x4e   : > { %p3283_p9 = pneg %p3282_p11 }
  0x50   : > { %p3290_p1 = pnand %p3289_p13, %p3283_p9 }
  0x52   : > { %3293 = shalt.err (!%p3290_p1)
}
  0x53   : > { %s4047_s1 = smov 64   ;;  %s4048_s30 = smov 4  }
  0x54   : > { %3125 = dma.hbm_to_vmem [thread:$0]  (!%p4262_p12), %s5502_s7, 256, %s4258_s3, [#allocation7], %s4047_s1, %s4047_s1, %s4048_s30  }
  0x55   : > { %s5504_s19 = sld [smem:[#allocation77_spill]] }
  0x5b   : > { %s3294_s23 = scalar_lea.hbm %s5504_s19, 16 }
  0x5c   : > { %p3295_p5 = scmp.ne.s32.totalorder %s5504_s19, %s3294_s23  ;;  %p3301_p2 = scmp.lt.u32.totalorder %s3294_s23, %s5504_s19 }
  0x5e   : > { %p3297_p8 = pnand %p3295_p5, %p4278_p0 }
  0x60   : > { %p3298_p9 = pneg %p3297_p8 }
  0x62   : > { %p3303_p3 = pnand %p3301_p2, %p3298_p9 }
  0x64   : > { %3306 = shalt.err (!%p3303_p3)
}
  0x65   : > { %s3307_s3 = scalar_lea.vmem %s4266_s26, 16  ;;  %s3314_s16 = scalar_lea.vmem %s4266_s26, 32 }
  0x66   : > { %p3308_p6 = scmp.ne.s32.totalorder %s4266_s26, %s3307_s3  ;;  %p3315_p13 = scmp.lt.s32.totalorder %s4266_s26, %s4266_s26 }
  0x67   : > { %p3316_p1 = scmp.lt.s32.totalorder %s3314_s16, %s3307_s3 }
  0x68   : > { %p3310_p7 = pnand %p3308_p6, %p4278_p0 }
  0x69   : > { %p3317_p5 = por %p3316_p1, %p3315_p13 }
  0x6a   : > { %p3311_p11 = pneg %p3310_p7 }
  0x6c   : > { %p3318_p8 = pnand %p3317_p5, %p3311_p11 }
  0x6e   : > { %3321 = shalt.err (!%p3318_p8)
}
  0x6f   : > { %3131 = dma.hbm_to_vmem [thread:$0]  (!%p4262_p12), %s5504_s19, 16, %s4266_s26, [#allocation34]  }
  0x70   : > { %s5505_s21 = sld [smem:[#allocation79_spill]] }
  0x76   : > { %s3322_s29 = scalar_lea.hbm %s5505_s21, 256 }
  0x77   : > { %p3323_p9 = scmp.ne.s32.totalorder %s5505_s21, %s3322_s29  ;;  %p3329_p6 = scmp.lt.u32.totalorder %s3322_s29, %s5505_s21 }
  0x79   : > { %p3325_p2 = pnand %p3323_p9, %p4278_p0 }
  0x7b   : > { %p3326_p3 = pneg %p3325_p2 }
  0x7d   : > { %p3331_p7 = pnand %p3329_p6, %p3326_p3 }
  0x7f   : > { %3334 = shalt.err (!%p3331_p7)
}
  0x80   : > { %s3335_s16 = scalar_lea.vmem %s725_s6, 256  ;;  %p3343_p5 = scmp.lt.s32.totalorder %s725_s6, %s725_s6 }
  0x81   : > { %p3336_p11 = scmp.ne.s32.totalorder %s725_s6, %s3335_s16  ;;  %p3344_p8 = scmp.lt.s32.totalorder %s3335_s16, %s3335_s16 }
  0x83   : > { %p3338_p13 = pnand %p3336_p11, %p4278_p0  ;;  %p3345_p10 = por %p3344_p8, %p3343_p5 }
  0x85   : > { %p3339_p1 = pneg %p3338_p13 }
  0x87   : > { %p3346_p4 = pnand %p3345_p10, %p3339_p1 }
  0x89   : > { %3349 = shalt.err (!%p3346_p4)
}
  0x8a   : > { %3137 = dma.hbm_to_vmem [thread:$0]  (!%p4262_p12), %s5505_s21, 256, %s725_s6, [#allocation37], %s4047_s1, %s4047_s1, %s4048_s30  }
  0x8b   : > { %s4049_s14 = smov [#allocation3]   ;;  %s4050_s28 = smov [#allocation8]  }
  0x8c   : > { %s663_s18 = sshll.u32 %s4049_s14, 4  ;;  %s689_s29 = sshll.u32 %s4050_s28, 4  ;;  %s664_s18 = int_to_ptr.vmem [resolvable:$true] %s663_s18  ;;  %s690_s29 = int_to_ptr.vmem [resolvable:$true] %s689_s29 }
  0x8d   : > { %s5506_s23 = sld [smem:[#allocation64_spill]] }
  0x93   : > { %s3350_s3 = scalar_lea.hbm %s5506_s23, 256 }
  0x94   : > { %p3351_p4 = scmp.ne.s32.totalorder %s5506_s23, %s3350_s3  ;;  %p3357_p2 = scmp.lt.u32.totalorder %s3350_s3, %s5506_s23 }
  0x96   : > { %p3353_p10 = pnand %p3351_p4, %p4278_p0 }
  0x98   : > { %p3354_p9 = pneg %p3353_p10 }
  0x9a   : > { %p3359_p3 = pnand %p3357_p2, %p3354_p9 }
  0x9c   : > { %3362 = shalt.err (!%p3359_p3)
}
  0x9d   : > { %s3363_s6 = scalar_lea.vmem %s664_s18, 256  ;;  %p3371_p13 = scmp.lt.s32.totalorder %s664_s18, %s664_s18 }
  0x9e   : > { %p3364_p6 = scmp.ne.s32.totalorder %s664_s18, %s3363_s6  ;;  %p3372_p1 = scmp.lt.s32.totalorder %s3363_s6, %s3363_s6 }
  0xa0   : > { %p3366_p7 = pnand %p3364_p6, %p4278_p0  ;;  %p3373_p5 = por %p3372_p1, %p3371_p13 }
  0xa2   : > { %p3367_p11 = pneg %p3366_p7 }
  0xa4   : > { %p3374_p8 = pnand %p3373_p5, %p3367_p11 }
  0xa6   : > { %3377 = shalt.err (!%p3374_p8)
}
  0xa7   : > { %3122 = dma.hbm_to_vmem [thread:$0]  (!%p4262_p12), %s5506_s23, 256, %s664_s18, [#allocation4], %s4047_s1, %s4047_s1, %s4048_s30  }
  0xa8   : > { %s5507_s28 = sld [smem:[#allocation66_spill]] }
  0xae   : > { %s3378_s4 = scalar_lea.hbm %s5507_s28, 256 }
  0xaf   : > { %p3379_p4 = scmp.ne.s32.totalorder %s5507_s28, %s3378_s4  ;;  %p3385_p2 = scmp.lt.u32.totalorder %s3378_s4, %s5507_s28 }
  0xb1   : > { %p3381_p10 = pnand %p3379_p4, %p4278_p0 }
  0xb3   : > { %p3382_p9 = pneg %p3381_p10 }
  0xb5   : > { %p3387_p3 = pnand %p3385_p2, %p3382_p9 }
  0xb7   : > { %3390 = shalt.err (!%p3387_p3)
}
  0xb8   : > { %s3391_s6 = scalar_lea.vmem %s690_s29, 256  ;;  %p3399_p13 = scmp.lt.s32.totalorder %s690_s29, %s690_s29 }
  0xb9   : > { %p3392_p6 = scmp.ne.s32.totalorder %s690_s29, %s3391_s6  ;;  %p3400_p1 = scmp.lt.s32.totalorder %s3391_s6, %s3391_s6 }
  0xbb   : > { %p3394_p7 = pnand %p3392_p6, %p4278_p0  ;;  %p3401_p5 = por %p3400_p1, %p3399_p13 }
  0xbd   : > { %p3395_p11 = pneg %p3394_p7 }
  0xbf   : > { %p3402_p8 = pnand %p3401_p5, %p3395_p11 }
  0xc1   : > { %3405 = shalt.err (!%p3402_p8)
}
  0xc2   : > { %s4051_s1 = smov 128   ;;  %s4052_s30 = smov 8  }
  0xc3   : > { %3128 = dma.hbm_to_vmem [thread:$0]  (!%p4262_p12), %s5507_s28, 256, %s690_s29, [#allocation7], %s4051_s1, %s4051_s1, %s4052_s30  }
  0xc4   : > { %s4053_s7 = smov [#allocation35]   ;;  %s4054_s14 = smov [#allocation38]  }
  0xc5   : > { %s714_s12 = sshll.u32 %s4053_s7, 4  ;;  %s738_s4 = sshll.u32 %s4054_s14, 4  ;;  %s715_s12 = int_to_ptr.vmem [resolvable:$true] %s714_s12  ;;  %s739_s4 = int_to_ptr.vmem [resolvable:$true] %s738_s4 }
  0xc6   : > { %s5508_s20 = sld [smem:[#allocation78_spill]] }
  0xcc   : > { %s3406_s16 = scalar_lea.hbm %s5508_s20, 16 }
  0xcd   : > { %p3407_p4 = scmp.ne.s32.totalorder %s5508_s20, %s3406_s16  ;;  %p3413_p2 = scmp.lt.u32.totalorder %s3406_s16, %s5508_s20 }
  0xcf   : > { %p3409_p10 = pnand %p3407_p4, %p4278_p0 }
  0xd1   : > { %p3410_p9 = pneg %p3409_p10 }
  0xd3   : > { %p3415_p3 = pnand %p3413_p2, %p3410_p9 }
  0xd5   : > { %3418 = shalt.err (!%p3415_p3)
}
  0xd6   : > { %s3419_s29 = scalar_lea.vmem %s715_s12, 16  ;;  %s3426_s1 = scalar_lea.vmem %s715_s12, 32 }
  0xd7   : > { %p3420_p6 = scmp.ne.s32.totalorder %s715_s12, %s3419_s29  ;;  %p3427_p13 = scmp.lt.s32.totalorder %s715_s12, %s715_s12 }
  0xd8   : > { %p3428_p1 = scmp.lt.s32.totalorder %s3426_s1, %s3419_s29 }
  0xd9   : > { %p3422_p7 = pnand %p3420_p6, %p4278_p0 }
  0xda   : > { %p3429_p5 = por %p3428_p1, %p3427_p13 }
  0xdb   : > { %p3423_p11 = pneg %p3422_p7 }
  0xdd   : > { %p3430_p8 = pnand %p3429_p5, %p3423_p11 }
  0xdf   : > { %3433 = shalt.err (!%p3430_p8)
}
  0xe0   : > { %3134 = dma.hbm_to_vmem [thread:$0]  (!%p4262_p12), %s5508_s20, 16, %s715_s12, [#allocation34]  }
  0xe1   : > { %s3434_s19 = scalar_lea.hbm %s5429_s22, 16 }
  0xe2   : > { %p3435_p4 = scmp.ne.s32.totalorder %s5429_s22, %s3434_s19  ;;  %p3441_p2 = scmp.lt.u32.totalorder %s3434_s19, %s5429_s22 }
  0xe4   : > { %p3437_p10 = pnand %p3435_p4, %p4278_p0 }
  0xe6   : > { %p3438_p9 = pneg %p3437_p10 }
  0xe8   : > { %p3443_p3 = pnand %p3441_p2, %p3438_p9 }
  0xea   : > { %3446 = shalt.err (!%p3443_p3)
}
  0xeb   : > { %s3447_s16 = scalar_lea.vmem %s739_s4, 16  ;;  %s3454_s12 = scalar_lea.vmem %s739_s4, 32 }
  0xec   : > { %p3448_p6 = scmp.ne.s32.totalorder %s739_s4, %s3447_s16  ;;  %p3455_p13 = scmp.lt.s32.totalorder %s739_s4, %s739_s4 }
  0xed   : > { %p3456_p1 = scmp.lt.s32.totalorder %s3454_s12, %s3447_s16 }
  0xee   : > { %p3450_p7 = pnand %p3448_p6, %p4278_p0 }
  0xef   : > { %p3457_p5 = por %p3456_p1, %p3455_p13 }
  0xf0   : > { %p3451_p11 = pneg %p3450_p7 }
  0xf2   : > { %p3458_p8 = pnand %p3457_p5, %p3451_p11 }
  0xf4   : > { %3461 = shalt.err (!%p3458_p8)
}
  0xf5   : > { %3140 = dma.hbm_to_vmem [thread:$0]  (!%p4262_p12), %s5429_s22, 16, %s739_s4, [#allocation37]  }
  0xf6   : > { %p2811_p4 = scmp.ge.s32.totalorder %s4030_s25, 2 }
  0xf7   : > { %s4425_s5 = sand.u32 (!%p2811_p4), 1, %s4030_s25   ;;  %s4428_s29 = sand.u32 (!%p2811_p4), 1, %s4026_s24  }
  0xf8   : > { %745 = sbr.rel (%p2811_p4) target bundleno = 674 (0x2a2), region = 44  ;;  %s4431_s1 = sshll.u32 (!%p2811_p4), %s4030_s25, 4 }
  0xf9   : > { %s752_s0 = scalar_lea.vmem (!%p2811_p4), [#allocation9], %s4428_s29  ;;  %s5509_s21 = sld [smem:[#allocation67_spill]] (!%p2811_p4) }
  0xfa   : > { %s759_s30 = sshll.u32 (!%p2811_p4), %s752_s0, 4  ;;  %s5459_s19 = scalar_lea.sflag (!%p2811_p4), [#allocation10], %s4425_s5  ;;  %s760_s30 = int_to_ptr.vmem [resolvable:$true] %s759_s30 }
  0xfb   : > { %p5510_p0 = scmp.ne.s32.totalorder (!%p2811_p4), %s5496_s27, 0 }
  0xff   : > { %s4438_s23 = scalar_lea.hbm %s5509_s21, %s4431_s1  ;;  %s3466_s3 = scalar_lea.hbm %s5509_s21, 32 }
 0x100   : > { %s3462_s7 = scalar_lea.hbm %s4438_s23, 16  ;;  %p3467_p2 = scmp.lt.u32.totalorder %s4438_s23, %s5509_s21 }
 0x101   : > { %p3463_p12 = scmp.ne.s32.totalorder %s4438_s23, %s3462_s7  ;;  %p3468_p3 = scmp.lt.u32.totalorder %s3466_s3, %s3462_s7 }
 0x102   : > { %p3470_p7 = scmp.lt.u32.totalorder %s3462_s7, %s4438_s23 }
 0x103   : > { %p3464_p10 = pnand %p3463_p12, %p5510_p0  ;;  %p3469_p6 = por %p3468_p3, %p3467_p2 }
 0x105   : > { %p3465_p9 = pneg %p3464_p10  ;;  %p3471_p11 = por %p3470_p7, %p3469_p6 }
 0x107   : > { %p3472_p13 = pnand %p3471_p11, %p3465_p9 }
 0x109   : > { %3475 = shalt.err (!%p3472_p13)
}
 0x10a   : > { %s3476_s26 = scalar_lea.vmem %s760_s30, 16  ;;  %s4055_s6 = smov [#allocation9]  }
 0x10b   : > { %p3477_p1 = scmp.ne.s32.totalorder %s760_s30, %s3476_s26  ;;  %s3480_s0 = sshll.u32 %s4055_s6, 4  ;;  %s3481_s0 = int_to_ptr.vmem [resolvable:$false] %s3480_s0 }
 0x10c   : > { %s3482_s18 = scalar_lea.vmem %s3481_s0, 32  ;;  %p3483_p4 = scmp.lt.s32.totalorder %s760_s30, %s3481_s0 }
 0x10d   : > { %p3478_p5 = pnand %p3477_p1, %p5510_p0  ;;  %p3484_p12 = scmp.lt.s32.totalorder %s3482_s18, %s3476_s26 }
 0x10f   : > { %p3479_p8 = pneg %p3478_p5  ;;  %p3485_p10 = por %p3484_p12, %p3483_p4 }
 0x111   : > { %p3486_p2 = pnand %p3485_p10, %p3479_p8 }
 0x113   : > { %3489 = shalt.err (!%p3486_p2)
}
 0x114   : > { %3069 = dma.hbm_to_vmem [thread:$0]  (%p5510_p0), %s4438_s23, 16, %s760_s30, %s5459_s19  }
 0x115   : > { %s4461_s4 = sshll.u32 %s4428_s29, 4  ;;  %s4464_s7 = sshll.u32 %s4030_s25, 8 }
 0x116   : > { %s5511_s3 = sld [smem:[#allocation69_spill]]  ;;  %s787_s12 = scalar_lea.vmem [#allocation12], %s4461_s4 }
 0x117   : > { %s794_s26 = sshll.u32 %s787_s12, 4  ;;  %s5461_s30 = scalar_lea.sflag [#allocation13], %s4425_s5  ;;  %s4473_s26 = int_to_ptr.vmem [resolvable:$true] %s794_s26 }
 0x11c   : > { %s4470_s16 = scalar_lea.hbm %s5511_s3, %s4464_s7  ;;  %s3494_s18 = scalar_lea.hbm %s5511_s3, 512 }
 0x11d   : > { %s3490_s23 = scalar_lea.hbm %s4470_s16, 256  ;;  %p3495_p7 = scmp.lt.u32.totalorder %s4470_s16, %s5511_s3 }
 0x11e   : > { %p3491_p9 = scmp.ne.s32.totalorder %s4470_s16, %s3490_s23  ;;  %p3496_p11 = scmp.lt.u32.totalorder %s3494_s18, %s3490_s23 }
 0x11f   : > { %p3498_p1 = scmp.lt.u32.totalorder %s3490_s23, %s4470_s16 }
 0x120   : > { %p3492_p3 = pnand %p3491_p9, %p5510_p0  ;;  %p3497_p13 = por %p3496_p11, %p3495_p7 }
 0x122   : > { %p3493_p6 = pneg %p3492_p3  ;;  %p3499_p5 = por %p3498_p1, %p3497_p13 }
 0x124   : > { %p3500_p8 = pnand %p3499_p5, %p3493_p6 }
 0x126   : > { %3503 = shalt.err (!%p3500_p8)
}
 0x127   : > { %s3504_s12 = scalar_lea.vmem %s4473_s26, 256  ;;  %s4056_s6 = smov [#allocation12]  }
 0x128   : > { %p3505_p4 = scmp.ne.s32.totalorder %s4473_s26, %s3504_s12  ;;  %s3508_s0 = sshll.u32 %s4056_s6, 4  ;;  %s3509_s0 = int_to_ptr.vmem [resolvable:$false] %s3508_s0 }
 0x129   : > { %s3510_s14 = scalar_lea.vmem %s3509_s0, 512  ;;  %p3511_p2 = scmp.lt.s32.totalorder %s4473_s26, %s3509_s0 }
 0x12a   : > { %p3506_p12 = pnand %p3505_p4, %p5510_p0  ;;  %p3512_p9 = scmp.lt.s32.totalorder %s3510_s14, %s3504_s12 }
 0x12c   : > { %p3507_p10 = pneg %p3506_p12  ;;  %p3513_p3 = por %p3512_p9, %p3511_p2 }
 0x12e   : > { %p3514_p7 = pnand %p3513_p3, %p3507_p10 }
 0x130   : > { %3517 = shalt.err (!%p3514_p7)
}
 0x131   : > { %s5466_s23 = smov 64   ;;  %s4058_s18 = smov 4  }
 0x132   : > { %3071 = dma.hbm_to_vmem [thread:$0]  (%p5510_p0), %s4470_s16, 256, %s4473_s26, %s5461_s30, %s5466_s23, %s5466_s23, %s4058_s18  }
 0x133   : > { %s5512_s6 = sld [smem:[#allocation71_spill]]  ;;  %s825_s14 = scalar_lea.vmem [#allocation15], %s4461_s4 }
 0x134   : > { %s832_s19 = sshll.u32 %s825_s14, 4  ;;  %s5462_s3 = scalar_lea.sflag [#allocation16], %s4425_s5  ;;  %s4509_s19 = int_to_ptr.vmem [resolvable:$true] %s832_s19 }
 0x139   : > { %s4506_s0 = scalar_lea.hbm %s5512_s6, %s4464_s7  ;;  %s3522_s2 = scalar_lea.hbm %s5512_s6, 512 }
 0x13a   : > { %s3518_s20 = scalar_lea.hbm %s4506_s0, 256  ;;  %p3523_p1 = scmp.lt.u32.totalorder %s4506_s0, %s5512_s6 }
 0x13b   : > { %p3519_p6 = scmp.ne.s32.totalorder %s4506_s0, %s3518_s20  ;;  %p3524_p5 = scmp.lt.u32.totalorder %s3522_s2, %s3518_s20 }
 0x13c   : > { %p3526_p4 = scmp.lt.u32.totalorder %s3518_s20, %s4506_s0 }
 0x13d   : > { %p3520_p11 = pnand %p3519_p6, %p5510_p0  ;;  %p3525_p8 = por %p3524_p5, %p3523_p1 }
 0x13f   : > { %p3521_p13 = pneg %p3520_p11  ;;  %p3527_p12 = por %p3526_p4, %p3525_p8 }
 0x141   : > { %p3528_p10 = pnand %p3527_p12, %p3521_p13 }
 0x143   : > { %3531 = shalt.err (!%p3528_p10)
}
 0x144   : > { %s3532_s14 = scalar_lea.vmem %s4509_s19, 256  ;;  %s4059_s16 = smov [#allocation15]  }
 0x145   : > { %p3533_p2 = scmp.ne.s32.totalorder %s4509_s19, %s3532_s14  ;;  %s3536_s26 = sshll.u32 %s4059_s16, 4  ;;  %s3537_s26 = int_to_ptr.vmem [resolvable:$false] %s3536_s26 }
 0x146   : > { %s3538_s30 = scalar_lea.vmem %s3537_s26, 512  ;;  %p3539_p7 = scmp.lt.s32.totalorder %s4509_s19, %s3537_s26 }
 0x147   : > { %p3534_p9 = pnand %p3533_p2, %p5510_p0  ;;  %p3540_p6 = scmp.lt.s32.totalorder %s3538_s30, %s3532_s14 }
 0x149   : > { %p3535_p3 = pneg %p3534_p9  ;;  %p3541_p11 = por %p3540_p6, %p3539_p7 }
 0x14b   : > { %p3542_p1 = pnand %p3541_p11, %p3535_p3 }
 0x14d   : > { %3545 = shalt.err (!%p3542_p1)
}
 0x14e   : > { %3073 = dma.hbm_to_vmem [thread:$0]  (%p5510_p0), %s4506_s0, 256, %s4509_s19, %s5462_s3, %s5466_s23, %s5466_s23, %s4058_s18  }
 0x14f   : > { %s4542_s12 = scalar_lea.hbm %s5416_s9, %s4464_s7  ;;  %s863_s14 = scalar_lea.vmem [#allocation18], %s4461_s4 }
 0x150   : > { %s870_s16 = sshll.u32 %s863_s14, 4  ;;  %s5463_s26 = scalar_lea.sflag [#allocation19], %s4425_s5  ;;  %s4545_s16 = int_to_ptr.vmem [resolvable:$true] %s870_s16 }
 0x151   : > { %s3546_s30 = scalar_lea.hbm %s4542_s12, 256  ;;  %s3550_s20 = scalar_lea.hbm %s5416_s9, 512 }
 0x152   : > { %p3547_p13 = scmp.ne.s32.totalorder %s4542_s12, %s3546_s30  ;;  %p3551_p4 = scmp.lt.u32.totalorder %s4542_s12, %s5416_s9 }
 0x153   : > { %p3552_p12 = scmp.lt.u32.totalorder %s3550_s20, %s3546_s30  ;;  %p3554_p2 = scmp.lt.u32.totalorder %s3546_s30, %s4542_s12 }
 0x154   : > { %p3548_p5 = pnand %p3547_p13, %p5510_p0 }
 0x155   : > { %p3553_p10 = por %p3552_p12, %p3551_p4 }
 0x156   : > { %p3549_p8 = pneg %p3548_p5 }
 0x157   : > { %p3555_p9 = por %p3554_p2, %p3553_p10 }
 0x159   : > { %p3556_p3 = pnand %p3555_p9, %p3549_p8 }
 0x15b   : > { %3559 = shalt.err (!%p3556_p3)
}
 0x15c   : > { %s3560_s14 = scalar_lea.vmem %s4545_s16, 256  ;;  %s4060_s19 = smov [#allocation18]  }
 0x15d   : > { %p3561_p7 = scmp.ne.s32.totalorder %s4545_s16, %s3560_s14  ;;  %s3564_s0 = sshll.u32 %s4060_s19, 4  ;;  %s3565_s0 = int_to_ptr.vmem [resolvable:$false] %s3564_s0 }
 0x15e   : > { %s3566_s3 = scalar_lea.vmem %s3565_s0, 512  ;;  %p3567_p1 = scmp.lt.s32.totalorder %s4545_s16, %s3565_s0 }
 0x15f   : > { %p3562_p6 = pnand %p3561_p7, %p5510_p0  ;;  %p3568_p13 = scmp.lt.s32.totalorder %s3566_s3, %s3560_s14 }
 0x161   : > { %p3563_p11 = pneg %p3562_p6  ;;  %p3569_p5 = por %p3568_p13, %p3567_p1 }
 0x163   : > { %p3570_p4 = pnand %p3569_p5, %p3563_p11 }
 0x165   : > { %3573 = shalt.err (!%p3570_p4)
}
 0x166   : > { %3075 = dma.hbm_to_vmem [thread:$0]  (%p5510_p0), %s4542_s12, 256, %s4545_s16, %s5463_s26, %s5466_s23, %s5466_s23, %s4058_s18  }
 0x167   : > { %s4578_s2 = scalar_lea.hbm %s5418_s11, %s4464_s7  ;;  %s901_s14 = scalar_lea.vmem [#allocation21], %s4461_s4 }
 0x168   : > { %s908_s19 = sshll.u32 %s901_s14, 4  ;;  %s5465_s0 = scalar_lea.sflag [#allocation22], %s4425_s5  ;;  %s4581_s19 = int_to_ptr.vmem [resolvable:$true] %s908_s19 }
 0x169   : > { %s3574_s3 = scalar_lea.hbm %s4578_s2, 256  ;;  %s3578_s30 = scalar_lea.hbm %s5418_s11, 512 }
 0x16a   : > { %p3575_p8 = scmp.ne.s32.totalorder %s4578_s2, %s3574_s3  ;;  %p3579_p2 = scmp.lt.u32.totalorder %s4578_s2, %s5418_s11 }
 0x16b   : > { %p3580_p9 = scmp.lt.u32.totalorder %s3578_s30, %s3574_s3  ;;  %p3582_p7 = scmp.lt.u32.totalorder %s3574_s3, %s4578_s2 }
 0x16c   : > { %p3576_p12 = pnand %p3575_p8, %p5510_p0 }
 0x16d   : > { %p3581_p3 = por %p3580_p9, %p3579_p2 }
 0x16e   : > { %p3577_p10 = pneg %p3576_p12 }
 0x16f   : > { %p3583_p6 = por %p3582_p7, %p3581_p3 }
 0x171   : > { %p3584_p11 = pnand %p3583_p6, %p3577_p10 }
 0x173   : > { %3587 = shalt.err (!%p3584_p11)
}
 0x174   : > { %s3588_s14 = scalar_lea.vmem %s4581_s19, 256  ;;  %s4061_s12 = smov [#allocation21]  }
 0x175   : > { %p3589_p1 = scmp.ne.s32.totalorder %s4581_s19, %s3588_s14  ;;  %s3592_s16 = sshll.u32 %s4061_s12, 4  ;;  %s3593_s16 = int_to_ptr.vmem [resolvable:$false] %s3592_s16 }
 0x176   : > { %s3594_s26 = scalar_lea.vmem %s3593_s16, 512  ;;  %p3595_p4 = scmp.lt.s32.totalorder %s4581_s19, %s3593_s16 }
 0x177   : > { %p3590_p13 = pnand %p3589_p1, %p5510_p0  ;;  %p3596_p8 = scmp.lt.s32.totalorder %s3594_s26, %s3588_s14 }
 0x179   : > { %p3591_p5 = pneg %p3590_p13  ;;  %p3597_p12 = por %p3596_p8, %p3595_p4 }
 0x17b   : > { %p3598_p2 = pnand %p3597_p12, %p3591_p5 }
 0x17d   : > { %3601 = shalt.err (!%p3598_p2)
}
 0x17e   : > { %3077 = dma.hbm_to_vmem [thread:$0]  (%p5510_p0), %s4578_s2, 256, %s4581_s19, %s5465_s0, %s5466_s23, %s5466_s23, %s4058_s18  }
 0x17f   : > { %s4614_s20 = scalar_lea.hbm %s5420_s13, %s4431_s1  ;;  %s938_s14 = scalar_lea.vmem [#allocation24], %s4428_s29 }
 0x180   : > { %s945_s12 = sshll.u32 %s938_s14, 4  ;;  %s936_s16 = scalar_lea.sflag [#allocation25], %s4425_s5  ;;  %s946_s12 = int_to_ptr.vmem [resolvable:$true] %s945_s12 }
 0x181   : > { %s3602_s26 = scalar_lea.hbm %s4614_s20, 16  ;;  %s3606_s19 = scalar_lea.hbm %s5420_s13, 32 }
 0x182   : > { %p3603_p10 = scmp.ne.s32.totalorder %s4614_s20, %s3602_s26  ;;  %p3607_p7 = scmp.lt.u32.totalorder %s4614_s20, %s5420_s13 }
 0x183   : > { %p3608_p6 = scmp.lt.u32.totalorder %s3606_s19, %s3602_s26  ;;  %p3610_p1 = scmp.lt.u32.totalorder %s3602_s26, %s4614_s20 }
 0x184   : > { %p3604_p9 = pnand %p3603_p10, %p5510_p0 }
 0x185   : > { %p3609_p11 = por %p3608_p6, %p3607_p7 }
 0x186   : > { %p3605_p3 = pneg %p3604_p9 }
 0x187   : > { %p3611_p13 = por %p3610_p1, %p3609_p11 }
 0x189   : > { %p3612_p5 = pnand %p3611_p13, %p3605_p3 }
 0x18b   : > { %3615 = shalt.err (!%p3612_p5)
}
 0x18c   : > { %s3616_s14 = scalar_lea.vmem %s946_s12, 16  ;;  %s4062_s0 = smov [#allocation24]  }
 0x18d   : > { %p3617_p4 = scmp.ne.s32.totalorder %s946_s12, %s3616_s14  ;;  %s3620_s23 = sshll.u32 %s4062_s0, 4  ;;  %s3621_s23 = int_to_ptr.vmem [resolvable:$false] %s3620_s23 }
 0x18e   : > { %s3622_s6 = scalar_lea.vmem %s3621_s23, 32  ;;  %p3623_p2 = scmp.lt.s32.totalorder %s946_s12, %s3621_s23 }
 0x18f   : > { %p3618_p8 = pnand %p3617_p4, %p5510_p0  ;;  %p3624_p10 = scmp.lt.s32.totalorder %s3622_s6, %s3616_s14 }
 0x191   : > { %p3619_p12 = pneg %p3618_p8  ;;  %p3625_p9 = por %p3624_p10, %p3623_p2 }
 0x193   : > { %p3626_p6 = pnand %p3625_p9, %p3619_p12 }
 0x195   : > { %3629 = shalt.err (!%p3626_p6)
}
 0x196   : > { %3079 = dma.hbm_to_vmem [thread:$0]  (%p5510_p0), %s4614_s20, 16, %s946_s12, %s936_s16  }
 0x197   : > { %s4641_s2 = scalar_lea.hbm %s5422_s15, %s4464_s7  ;;  %s973_s23 = scalar_lea.vmem [#allocation27], %s4461_s4 }
 0x198   : > { %s980_s19 = sshll.u32 %s973_s23, 4  ;;  %s2836_s3 = sshll.u32 %s4428_s29, 6  ;;  %s4644_s19 = int_to_ptr.vmem [resolvable:$true] %s980_s19 }
 0x199   : > { %s5469_s30 = scalar_lea.sflag [#allocation28], %s4425_s5  ;;  %s3630_s14 = scalar_lea.hbm %s4641_s2, 256 }
 0x19a   : > { %p3631_p3 = scmp.ne.s32.totalorder %s4641_s2, %s3630_s14  ;;  %s3634_s7 = scalar_lea.hbm %s5422_s15, 512 }
 0x19b   : > { %p3635_p1 = scmp.lt.u32.totalorder %s4641_s2, %s5422_s15  ;;  %p3636_p13 = scmp.lt.u32.totalorder %s3634_s7, %s3630_s14 }
 0x19c   : > { %p3632_p7 = pnand %p3631_p3, %p5510_p0  ;;  %p3638_p4 = scmp.lt.u32.totalorder %s3630_s14, %s4641_s2 }
 0x19d   : > { %p3637_p5 = por %p3636_p13, %p3635_p1 }
 0x19e   : > { %p3633_p11 = pneg %p3632_p7 }
 0x19f   : > { %p3639_p8 = por %p3638_p4, %p3637_p5 }
 0x1a1   : > { %p3640_p12 = pnand %p3639_p8, %p3633_p11 }
 0x1a3   : > { %3643 = shalt.err (!%p3640_p12)
}
 0x1a4   : > { %s3644_s4 = scalar_lea.vmem %s4644_s19, 256  ;;  %s4063_s0 = smov [#allocation27]  }
 0x1a5   : > { %p3645_p2 = scmp.ne.s32.totalorder %s4644_s19, %s3644_s4  ;;  %s3648_s23 = sshll.u32 %s4063_s0, 4  ;;  %s3649_s23 = int_to_ptr.vmem [resolvable:$false] %s3648_s23 }
 0x1a6   : > { %s3650_s20 = scalar_lea.vmem %s3649_s23, 512  ;;  %p3651_p6 = scmp.lt.s32.totalorder %s4644_s19, %s3649_s23 }
 0x1a7   : > { %p3646_p10 = pnand %p3645_p2, %p5510_p0  ;;  %p3652_p3 = scmp.lt.s32.totalorder %s3650_s20, %s3644_s4 }
 0x1a9   : > { %p3647_p9 = pneg %p3646_p10  ;;  %p3653_p7 = por %p3652_p3, %p3651_p6 }
 0x1ab   : > { %p3654_p1 = pnand %p3653_p7, %p3647_p9 }
 0x1ad   : > { %3657 = shalt.err (!%p3654_p1)
}
 0x1ae   : > { %s5513_s14 = smov 64   ;;  %s2916_s12 = sshll.u32 %s4030_s25, 10 }
 0x1af   : > { %3081 = dma.hbm_to_vmem [thread:$0]  (%p5510_p0), %s4641_s2, 256, %s4644_s19, %s5469_s30, %s5513_s14, %s5513_s14, %s4058_s18  }
 0x1b0   : > { %s4678_s26 = scalar_lea.hbm %s5424_s17, %s2916_s12  ;;  %s1011_s4 = scalar_lea.vmem [#allocation30], %s2836_s3 }
 0x1b1   : > { %s1018_s0 = sshll.u32 %s1011_s4, 4  ;;  %s5468_s23 = scalar_lea.sflag [#allocation31], %s4425_s5  ;;  %s4682_s0 = int_to_ptr.vmem [resolvable:$true] %s1018_s0 }
 0x1b2   : > { %s3658_s20 = scalar_lea.hbm %s4678_s26, 1024  ;;  %s3662_s19 = scalar_lea.hbm %s5424_s17, 2048 }
 0x1b3   : > { %p3659_p11 = scmp.ne.s32.totalorder %s4678_s26, %s3658_s20  ;;  %p3663_p4 = scmp.lt.u32.totalorder %s4678_s26, %s5424_s17 }
 0x1b4   : > { %p3664_p8 = scmp.lt.u32.totalorder %s3662_s19, %s3658_s20  ;;  %p3666_p2 = scmp.lt.u32.totalorder %s3658_s20, %s4678_s26 }
 0x1b5   : > { %p3660_p13 = pnand %p3659_p11, %p5510_p0 }
 0x1b6   : > { %p3665_p12 = por %p3664_p8, %p3663_p4 }
 0x1b7   : > { %p3661_p5 = pneg %p3660_p13 }
 0x1b8   : > { %p3667_p10 = por %p3666_p2, %p3665_p12 }
 0x1ba   : > { %p3668_p9 = pnand %p3667_p10, %p3661_p5 }
 0x1bc   : > { %3671 = shalt.err (!%p3668_p9)
}
 0x1bd   : > { %s3672_s3 = scalar_lea.vmem %s4682_s0, 1024  ;;  %s4064_s6 = smov [#allocation30]  }
 0x1be   : > { %p3673_p6 = scmp.ne.s32.totalorder %s4682_s0, %s3672_s3  ;;  %s3676_s4 = sshll.u32 %s4064_s6, 4  ;;  %s3677_s4 = int_to_ptr.vmem [resolvable:$false] %s3676_s4 }
 0x1bf   : > { %s3678_s25 = scalar_lea.vmem %s3677_s4, 2048  ;;  %p3679_p1 = scmp.lt.s32.totalorder %s4682_s0, %s3677_s4 }
 0x1c0   : > { %p3674_p3 = pnand %p3673_p6, %p5510_p0  ;;  %p3680_p11 = scmp.lt.s32.totalorder %s3678_s25, %s3672_s3 }
 0x1c2   : > { %p3675_p7 = pneg %p3674_p3  ;;  %p3681_p13 = por %p3680_p11, %p3679_p1 }
 0x1c4   : > { %p3682_p4 = pnand %p3681_p13, %p3675_p7 }
 0x1c6   : > { %3685 = shalt.err (!%p3682_p4)
}
 0x1c7   : > { %3083 = dma.hbm_to_vmem [thread:$0]  (%p5510_p0), %s4678_s26, 1024, %s4682_s0, %s5468_s23, %s5513_s14, %s5513_s14, %s4058_s18  }
 0x1c8   : > { %s5514_s19 = sld [smem:[#allocation68_spill]]  ;;  %s769_s7 = scalar_lea.vmem [#allocation11], %s4428_s29 }
 0x1c9   : > { %s776_s3 = sshll.u32 %s769_s7, 4  ;;  %s777_s3 = int_to_ptr.vmem [resolvable:$true] %s776_s3 }
 0x1ce   : > { %s4715_s12 = scalar_lea.hbm %s5514_s19, %s4431_s1  ;;  %s3690_s18 = scalar_lea.hbm %s5514_s19, 32 }
 0x1cf   : > { %s3686_s6 = scalar_lea.hbm %s4715_s12, 16  ;;  %p3691_p2 = scmp.lt.u32.totalorder %s4715_s12, %s5514_s19 }
 0x1d0   : > { %p3687_p5 = scmp.ne.s32.totalorder %s4715_s12, %s3686_s6  ;;  %p3692_p10 = scmp.lt.u32.totalorder %s3690_s18, %s3686_s6 }
 0x1d1   : > { %p3694_p6 = scmp.lt.u32.totalorder %s3686_s6, %s4715_s12 }
 0x1d2   : > { %p3688_p8 = pnand %p3687_p5, %p5510_p0  ;;  %p3693_p9 = por %p3692_p10, %p3691_p2 }
 0x1d4   : > { %p3689_p12 = pneg %p3688_p8  ;;  %p3695_p3 = por %p3694_p6, %p3693_p9 }
 0x1d6   : > { %p3696_p7 = pnand %p3695_p3, %p3689_p12 }
 0x1d8   : > { %3699 = shalt.err (!%p3696_p7)
}
 0x1d9   : > { %s3700_s0 = scalar_lea.vmem %s777_s3, 16  ;;  %s4065_s20 = smov [#allocation11]  }
 0x1da   : > { %p3701_p1 = scmp.ne.s32.totalorder %s777_s3, %s3700_s0  ;;  %s3704_s2 = sshll.u32 %s4065_s20, 4  ;;  %s3705_s2 = int_to_ptr.vmem [resolvable:$false] %s3704_s2 }
 0x1db   : > { %s3706_s7 = scalar_lea.vmem %s3705_s2, 32  ;;  %p3707_p4 = scmp.lt.s32.totalorder %s777_s3, %s3705_s2 }
 0x1dc   : > { %p3702_p11 = pnand %p3701_p1, %p5510_p0  ;;  %p3708_p5 = scmp.lt.s32.totalorder %s3706_s7, %s3700_s0 }
 0x1de   : > { %p3703_p13 = pneg %p3702_p11  ;;  %p3709_p8 = por %p3708_p5, %p3707_p4 }
 0x1e0   : > { %p3710_p2 = pnand %p3709_p8, %p3703_p13 }
 0x1e2   : > { %3713 = shalt.err (!%p3710_p2)
}
 0x1e3   : > { %s5515_s6 = scalar_lea.sflag [#allocation10], %s4425_s5  ;;  %s5516_s18 = sld [smem:[#allocation70_spill]] }
 0x1e4   : > { %3070 = dma.hbm_to_vmem [thread:$0]  (%p5510_p0), %s4715_s12, 16, %s777_s3, %s5515_s6  }
 0x1e5   : > { %s807_s26 = scalar_lea.vmem [#allocation14], %s4428_s29 }
 0x1e6   : > { %s814_s0 = sshll.u32 %s807_s26, 4  ;;  %s815_s0 = int_to_ptr.vmem [resolvable:$true] %s814_s0 }
 0x1e9   : > { %s4741_s14 = scalar_lea.hbm %s5516_s18, %s4431_s1  ;;  %s3718_s12 = scalar_lea.hbm %s5516_s18, 32 }
 0x1ea   : > { %s3714_s20 = scalar_lea.hbm %s4741_s14, 16  ;;  %p3719_p6 = scmp.lt.u32.totalorder %s4741_s14, %s5516_s18 }
 0x1eb   : > { %p3715_p12 = scmp.ne.s32.totalorder %s4741_s14, %s3714_s20  ;;  %p3720_p3 = scmp.lt.u32.totalorder %s3718_s12, %s3714_s20 }
 0x1ec   : > { %p3722_p1 = scmp.lt.u32.totalorder %s3714_s20, %s4741_s14 }
 0x1ed   : > { %p3716_p10 = pnand %p3715_p12, %p5510_p0  ;;  %p3721_p7 = por %p3720_p3, %p3719_p6 }
 0x1ef   : > { %p3717_p9 = pneg %p3716_p10  ;;  %p3723_p11 = por %p3722_p1, %p3721_p7 }
 0x1f1   : > { %p3724_p13 = pnand %p3723_p11, %p3717_p9 }
 0x1f3   : > { %3727 = shalt.err (!%p3724_p13)
}
 0x1f4   : > { %s3728_s4 = scalar_lea.vmem %s815_s0, 16  ;;  %s4066_s25 = smov [#allocation14]  }
 0x1f5   : > { %p3729_p4 = scmp.ne.s32.totalorder %s815_s0, %s3728_s4  ;;  %s3732_s26 = sshll.u32 %s4066_s25, 4  ;;  %s3733_s26 = int_to_ptr.vmem [resolvable:$false] %s3732_s26 }
 0x1f6   : > { %s3734_s2 = scalar_lea.vmem %s3733_s26, 32  ;;  %p3735_p2 = scmp.lt.s32.totalorder %s815_s0, %s3733_s26 }
 0x1f7   : > { %p3730_p5 = pnand %p3729_p4, %p5510_p0  ;;  %p3736_p12 = scmp.lt.s32.totalorder %s3734_s2, %s3728_s4 }
 0x1f9   : > { %p3731_p8 = pneg %p3730_p5  ;;  %p3737_p10 = por %p3736_p12, %p3735_p2 }
 0x1fb   : > { %p3738_p3 = pnand %p3737_p10, %p3731_p8 }
 0x1fd   : > { %3741 = shalt.err (!%p3738_p3)
}
 0x1fe   : > { %s5517_s20 = scalar_lea.sflag [#allocation13], %s4425_s5  ;;  %s5518_s8 = sld [smem:[#allocation72_spill]] }
 0x1ff   : > { %3072 = dma.hbm_to_vmem [thread:$0]  (%p5510_p0), %s4741_s14, 16, %s815_s0, %s5517_s20  }
 0x200   : > { %s845_s6 = scalar_lea.vmem [#allocation17], %s4428_s29 }
 0x201   : > { %s852_s4 = sshll.u32 %s845_s6, 4  ;;  %s853_s4 = int_to_ptr.vmem [resolvable:$true] %s852_s4 }
 0x204   : > { %s4767_s3 = scalar_lea.hbm %s5518_s8, %s4431_s1  ;;  %s3746_s14 = scalar_lea.hbm %s5518_s8, 32 }
 0x205   : > { %s3742_s25 = scalar_lea.hbm %s4767_s3, 16  ;;  %p3747_p1 = scmp.lt.u32.totalorder %s4767_s3, %s5518_s8 }
 0x206   : > { %p3743_p9 = scmp.ne.s32.totalorder %s4767_s3, %s3742_s25  ;;  %p3748_p11 = scmp.lt.u32.totalorder %s3746_s14, %s3742_s25 }
 0x207   : > { %p3750_p4 = scmp.lt.u32.totalorder %s3742_s25, %s4767_s3 }
 0x208   : > { %p3744_p6 = pnand %p3743_p9, %p5510_p0  ;;  %p3749_p13 = por %p3748_p11, %p3747_p1 }
 0x20a   : > { %p3745_p7 = pneg %p3744_p6  ;;  %p3751_p5 = por %p3750_p4, %p3749_p13 }
 0x20c   : > { %p3752_p8 = pnand %p3751_p5, %p3745_p7 }
 0x20e   : > { %3755 = shalt.err (!%p3752_p8)
}
 0x20f   : > { %s3756_s7 = scalar_lea.vmem %s853_s4, 16  ;;  %s4067_s12 = smov [#allocation17]  }
 0x210   : > { %p3757_p2 = scmp.ne.s32.totalorder %s853_s4, %s3756_s7  ;;  %s3760_s6 = sshll.u32 %s4067_s12, 4  ;;  %s3761_s6 = int_to_ptr.vmem [resolvable:$false] %s3760_s6 }
 0x211   : > { %s3762_s26 = scalar_lea.vmem %s3761_s6, 32  ;;  %p3763_p3 = scmp.lt.s32.totalorder %s853_s4, %s3761_s6 }
 0x212   : > { %p3758_p12 = pnand %p3757_p2, %p5510_p0  ;;  %p3764_p9 = scmp.lt.s32.totalorder %s3762_s26, %s3756_s7 }
 0x214   : > { %p3759_p10 = pneg %p3758_p12  ;;  %p3765_p6 = por %p3764_p9, %p3763_p3 }
 0x216   : > { %p3766_p1 = pnand %p3765_p6, %p3759_p10 }
 0x218   : > { %3769 = shalt.err (!%p3766_p1)
}
 0x219   : > { %s5519_s25 = scalar_lea.sflag [#allocation16], %s4425_s5  ;;  %s4793_s0 = scalar_lea.hbm %s5417_s10, %s4431_s1 }
 0x21a   : > { %3074 = dma.hbm_to_vmem [thread:$0]  (%p5510_p0), %s4767_s3, 16, %s853_s4, %s5519_s25  }
 0x21b   : > { %s883_s20 = scalar_lea.vmem [#allocation20], %s4428_s29  ;;  %s3770_s12 = scalar_lea.hbm %s4793_s0, 16 }
 0x21c   : > { %s890_s7 = sshll.u32 %s883_s20, 4  ;;  %p3771_p7 = scmp.ne.s32.totalorder %s4793_s0, %s3770_s12  ;;  %s891_s7 = int_to_ptr.vmem [resolvable:$true] %s890_s7 }
 0x21d   : > { %s3774_s3 = scalar_lea.hbm %s5417_s10, 32  ;;  %p3775_p4 = scmp.lt.u32.totalorder %s4793_s0, %s5417_s10 }
 0x21e   : > { %p3772_p11 = pnand %p3771_p7, %p5510_p0  ;;  %p3776_p5 = scmp.lt.u32.totalorder %s3774_s3, %s3770_s12 }
 0x21f   : > { %p3778_p2 = scmp.lt.u32.totalorder %s3770_s12, %s4793_s0 }
 0x220   : > { %p3773_p13 = pneg %p3772_p11  ;;  %p3777_p8 = por %p3776_p5, %p3775_p4 }
 0x222   : > { %p3779_p12 = por %p3778_p2, %p3777_p8 }
 0x224   : > { %p3780_p10 = pnand %p3779_p12, %p3773_p13 }
 0x226   : > { %3783 = shalt.err (!%p3780_p10)
}
 0x227   : > { %s3784_s2 = scalar_lea.vmem %s891_s7, 16  ;;  %s4068_s14 = smov [#allocation20]  }
 0x228   : > { %p3785_p3 = scmp.ne.s32.totalorder %s891_s7, %s3784_s2  ;;  %s3788_s20 = sshll.u32 %s4068_s14, 4  ;;  %s3789_s20 = int_to_ptr.vmem [resolvable:$false] %s3788_s20 }
 0x229   : > { %s3790_s6 = scalar_lea.vmem %s3789_s20, 32  ;;  %p3791_p1 = scmp.lt.s32.totalorder %s891_s7, %s3789_s20 }
 0x22a   : > { %p3786_p9 = pnand %p3785_p3, %p5510_p0  ;;  %p3792_p7 = scmp.lt.s32.totalorder %s3790_s6, %s3784_s2 }
 0x22c   : > { %p3787_p6 = pneg %p3786_p9  ;;  %p3793_p11 = por %p3792_p7, %p3791_p1 }
 0x22e   : > { %p3794_p4 = pnand %p3793_p11, %p3787_p6 }
 0x230   : > { %3797 = shalt.err (!%p3794_p4)
}
 0x231   : > { %s5520_s12 = scalar_lea.sflag [#allocation19], %s4425_s5  ;;  %s5521_s4 = sld [smem:[#allocation73_spill]] }
 0x232   : > { %3076 = dma.hbm_to_vmem [thread:$0]  (%p5510_p0), %s4793_s0, 16, %s891_s7, %s5520_s12  }
 0x233   : > { %s921_s2 = scalar_lea.vmem [#allocation23], %s4428_s29 }
 0x234   : > { %s928_s14 = sshll.u32 %s921_s2, 4  ;;  %s929_s14 = int_to_ptr.vmem [resolvable:$true] %s928_s14 }
 0x237   : > { %s5522_s23 = smov %s5521_s4  ;;  %s4819_s25 = scalar_lea.hbm %s5521_s4, %s4431_s1 }
 0x238   : > { %s3798_s20 = scalar_lea.hbm %s4819_s25, 16  ;;  %s3802_s0 = scalar_lea.hbm %s5522_s23, 32 }
 0x239   : > { %p3799_p13 = scmp.ne.s32.totalorder %s4819_s25, %s3798_s20  ;;  %p3803_p2 = scmp.lt.u32.totalorder %s4819_s25, %s5522_s23 }
 0x23a   : > { %p3804_p12 = scmp.lt.u32.totalorder %s3802_s0, %s3798_s20  ;;  %p3806_p3 = scmp.lt.u32.totalorder %s3798_s20, %s4819_s25 }
 0x23b   : > { %p3800_p5 = pnand %p3799_p13, %p5510_p0 }
 0x23c   : > { %p3805_p10 = por %p3804_p12, %p3803_p2 }
 0x23d   : > { %p3801_p8 = pneg %p3800_p5 }
 0x23e   : > { %p3807_p9 = por %p3806_p3, %p3805_p10 }
 0x240   : > { %p3808_p6 = pnand %p3807_p9, %p3801_p8 }
 0x242   : > { %3811 = shalt.err (!%p3808_p6)
}
 0x243   : > { %s3812_s26 = scalar_lea.vmem %s929_s14, 16  ;;  %s4069_s3 = smov [#allocation23]  }
 0x244   : > { %p3813_p1 = scmp.ne.s32.totalorder %s929_s14, %s3812_s26  ;;  %s3816_s4 = sshll.u32 %s4069_s3, 4  ;;  %s3817_s4 = int_to_ptr.vmem [resolvable:$false] %s3816_s4 }
 0x245   : > { %s3818_s30 = scalar_lea.vmem %s3817_s4, 32  ;;  %p3819_p4 = scmp.lt.s32.totalorder %s929_s14, %s3817_s4 }
 0x246   : > { %p3814_p7 = pnand %p3813_p1, %p5510_p0  ;;  %p3820_p13 = scmp.lt.s32.totalorder %s3818_s30, %s3812_s26 }
 0x248   : > { %p3815_p11 = pneg %p3814_p7  ;;  %p3821_p5 = por %p3820_p13, %p3819_p4 }
 0x24a   : > { %p3822_p2 = pnand %p3821_p5, %p3815_p11 }
 0x24c   : > { %3825 = shalt.err (!%p3822_p2)
}
 0x24d   : > { %s5523_s2 = scalar_lea.sflag [#allocation22], %s4425_s5  ;;  %s5524_s0 = sld [smem:[#allocation74_spill]] }
 0x24e   : > { %3078 = dma.hbm_to_vmem [thread:$0]  (%p5510_p0), %s4819_s25, 16, %s929_s14, %s5523_s2  }
 0x24f   : > { %s955_s12 = scalar_lea.vmem [#allocation26], %s4428_s29 }
 0x250   : > { %s962_s26 = sshll.u32 %s955_s12, 4  ;;  %s963_s26 = int_to_ptr.vmem [resolvable:$true] %s962_s26 }
 0x253   : > { %s4845_s7 = scalar_lea.hbm %s5524_s0, %s4431_s1  ;;  %s3830_s25 = scalar_lea.hbm %s5524_s0, 32 }
 0x254   : > { %s3826_s3 = scalar_lea.hbm %s4845_s7, 16  ;;  %p3831_p3 = scmp.lt.u32.totalorder %s4845_s7, %s5524_s0 }
 0x255   : > { %p3827_p8 = scmp.ne.s32.totalorder %s4845_s7, %s3826_s3  ;;  %p3832_p9 = scmp.lt.u32.totalorder %s3830_s25, %s3826_s3 }
 0x256   : > { %p3834_p1 = scmp.lt.u32.totalorder %s3826_s3, %s4845_s7 }
 0x257   : > { %p3828_p12 = pnand %p3827_p8, %p5510_p0  ;;  %p3833_p6 = por %p3832_p9, %p3831_p3 }
 0x259   : > { %p3829_p10 = pneg %p3828_p12  ;;  %p3835_p7 = por %p3834_p1, %p3833_p6 }
 0x25b   : > { %p3836_p11 = pnand %p3835_p7, %p3829_p10 }
 0x25d   : > { %3839 = shalt.err (!%p3836_p11)
}
 0x25e   : > { %s3840_s20 = scalar_lea.vmem %s963_s26, 16  ;;  %s4070_s6 = smov [#allocation26]  }
 0x25f   : > { %p3841_p4 = scmp.ne.s32.totalorder %s963_s26, %s3840_s20  ;;  %s3844_s12 = sshll.u32 %s4070_s6, 4  ;;  %s3845_s12 = int_to_ptr.vmem [resolvable:$false] %s3844_s12 }
 0x260   : > { %s3846_s4 = scalar_lea.vmem %s3845_s12, 32  ;;  %p3847_p2 = scmp.lt.s32.totalorder %s963_s26, %s3845_s12 }
 0x261   : > { %p3842_p13 = pnand %p3841_p4, %p5510_p0  ;;  %p3848_p8 = scmp.lt.s32.totalorder %s3846_s4, %s3840_s20 }
 0x263   : > { %p3843_p5 = pneg %p3842_p13  ;;  %p3849_p12 = por %p3848_p8, %p3847_p2 }
 0x265   : > { %p3850_p3 = pnand %p3849_p12, %p3843_p5 }
 0x267   : > { %3853 = shalt.err (!%p3850_p3)
}
 0x268   : > { %3080 = dma.hbm_to_vmem [thread:$0]  (%p5510_p0), %s4845_s7, 16, %s963_s26, %s936_s16  }
 0x269   : > { %s5525_s25 = sld [smem:[#allocation75_spill]]  ;;  %s993_s20 = scalar_lea.vmem [#allocation29], %s4428_s29 }
 0x26a   : > { %s1000_s6 = sshll.u32 %s993_s20, 4  ;;  %s1001_s6 = int_to_ptr.vmem [resolvable:$true] %s1000_s6 }
 0x26f   : > { %s5526_s14 = smov %s5525_s25  ;;  %s4871_s2 = scalar_lea.hbm %s5525_s25, %s4431_s1 }
 0x270   : > { %s3854_s12 = scalar_lea.hbm %s4871_s2, 16  ;;  %s3858_s16 = scalar_lea.hbm %s5526_s14, 32 }
 0x271   : > { %p3855_p10 = scmp.ne.s32.totalorder %s4871_s2, %s3854_s12  ;;  %p3859_p1 = scmp.lt.u32.totalorder %s4871_s2, %s5526_s14 }
 0x272   : > { %p3860_p7 = scmp.lt.u32.totalorder %s3858_s16, %s3854_s12  ;;  %p3862_p4 = scmp.lt.u32.totalorder %s3854_s12, %s4871_s2 }
 0x273   : > { %p3856_p9 = pnand %p3855_p10, %p5510_p0 }
 0x274   : > { %p3861_p11 = por %p3860_p7, %p3859_p1 }
 0x275   : > { %p3857_p6 = pneg %p3856_p9 }
 0x276   : > { %p3863_p13 = por %p3862_p4, %p3861_p11 }
 0x278   : > { %p3864_p5 = pnand %p3863_p13, %p3857_p6 }
 0x27a   : > { %3867 = shalt.err (!%p3864_p5)
}
 0x27b   : > { %s3868_s3 = scalar_lea.vmem %s1001_s6, 16  ;;  %s4071_s30 = smov [#allocation29]  }
 0x27c   : > { %p3869_p2 = scmp.ne.s32.totalorder %s1001_s6, %s3868_s3  ;;  %s3872_s25 = sshll.u32 %s4071_s30, 4  ;;  %s3873_s25 = int_to_ptr.vmem [resolvable:$false] %s3872_s25 }
 0x27d   : > { %s3874_s0 = scalar_lea.vmem %s3873_s25, 32  ;;  %p3875_p3 = scmp.lt.s32.totalorder %s1001_s6, %s3873_s25 }
 0x27e   : > { %p3870_p8 = pnand %p3869_p2, %p5510_p0  ;;  %p3876_p10 = scmp.lt.s32.totalorder %s3874_s0, %s3868_s3 }
 0x280   : > { %p3871_p12 = pneg %p3870_p8  ;;  %p3877_p9 = por %p3876_p10, %p3875_p3 }
 0x282   : > { %p3878_p1 = pnand %p3877_p9, %p3871_p12 }
 0x284   : > { %3881 = shalt.err (!%p3878_p1)
}
 0x285   : > { %s5527_s20 = scalar_lea.sflag [#allocation28], %s4425_s5  ;;  %s5528_s16 = sld [smem:[#allocation76_spill]] }
 0x286   : > { %3082 = dma.hbm_to_vmem [thread:$0]  (%p5510_p0), %s4871_s2, 16, %s1001_s6, %s5527_s20  }
 0x287   : > { %s1031_s26 = scalar_lea.vmem [#allocation32], %s4428_s29 }
 0x288   : > { %s1038_s3 = sshll.u32 %s1031_s26, 4  ;;  %s1039_s3 = int_to_ptr.vmem [resolvable:$true] %s1038_s3 }
 0x28b   : > { %s4897_s7 = scalar_lea.hbm %s5528_s16, %s4431_s1  ;;  %s3886_s2 = scalar_lea.hbm %s5528_s16, 32 }
 0x28c   : > { %s3882_s30 = scalar_lea.hbm %s4897_s7, 16  ;;  %p3887_p4 = scmp.lt.u32.totalorder %s4897_s7, %s5528_s16 }
 0x28d   : > { %p3883_p6 = scmp.ne.s32.totalorder %s4897_s7, %s3882_s30  ;;  %p3888_p13 = scmp.lt.u32.totalorder %s3886_s2, %s3882_s30 }
 0x28e   : > { %p3890_p2 = scmp.lt.u32.totalorder %s3882_s30, %s4897_s7 }
 0x28f   : > { %p3884_p7 = pnand %p3883_p6, %p5510_p0  ;;  %p3889_p5 = por %p3888_p13, %p3887_p4 }
 0x291   : > { %p3885_p11 = pneg %p3884_p7  ;;  %p3891_p8 = por %p3890_p2, %p3889_p5 }
 0x293   : > { %p3892_p12 = pnand %p3891_p8, %p3885_p11 }
 0x295   : > { %3895 = shalt.err (!%p3892_p12)
}
 0x296   : > { %s3896_s29 = scalar_lea.vmem %s1039_s3, 16  ;;  %s4072_s1 = smov [#allocation32]  }
 0x297   : > { %p3897_p3 = scmp.ne.s32.totalorder %s1039_s3, %s3896_s29  ;;  %s3900_s12 = sshll.u32 %s4072_s1, 4  ;;  %s3901_s12 = int_to_ptr.vmem [resolvable:$false] %s3900_s12 }
 0x298   : > { %s3902_s4 = scalar_lea.vmem %s3901_s12, 32  ;;  %p3903_p1 = scmp.lt.s32.totalorder %s1039_s3, %s3901_s12 }
 0x299   : > { %p3898_p10 = pnand %p3897_p3, %p5510_p0  ;;  %p3904_p6 = scmp.lt.s32.totalorder %s3902_s4, %s3896_s29 }
 0x29b   : > { %p3899_p9 = pneg %p3898_p10  ;;  %p3905_p7 = por %p3904_p6, %p3903_p1 }
 0x29d   : > { %p3906_p4 = pnand %p3905_p7, %p3899_p9 }
 0x29f   : > { %3909 = shalt.err (!%p3906_p4)
}
 0x2a0   : > { %s5529_s26 = scalar_lea.sflag [#allocation31], %s4425_s5 }
 0x2a1   : > { %3084 = dma.hbm_to_vmem [thread:$0]  (%p5510_p0), %s4897_s7, 16, %s1039_s3, %s5529_s26  }
 0x2a2 PF: > { %s5530_s30 = sld [smem:[#allocation58_spill]] }
 0x2a8   : > { %p5531_p11 = scmp.ne.s32.totalorder %s5530_s30, 0 }
 0x2aa   : > { %1047 = sbr.rel (%p5531_p11) target bundleno = 4075 (0xfeb), region = 112 }
 0x2b1   : > { %s5532_s25 = sld [smem:[#allocation54_spill]] }
 0x2b7   : > { %p5533_p13 = scmp.eq.s32.totalorder %s5532_s25, 0 }
 0x2b9   : > { %3965 = dma.done.wait (%p5533_p13), [#allocation4], 256   ;;  %p5534_p5 = pmov %p5533_p13 }
 0x2bb   : > { %3967 = vsyncadd (%p5534_p5), [#allocation4], 4294967040  ;;  %p5535_p2 = pmov %p5534_p5 }
 0x2bd   : > { %3969 = dma.done.wait (%p5535_p2), [#allocation7], 512   ;;  %p5536_p8 = pmov %p5535_p2 }
 0x2be   : > { %s5537_s27 = sld [smem:[#allocation53_spill]]  ;;  %s5538_s5 = sld [smem:[#allocation57_spill]] }
 0x2bf   : > { %3971 = vsyncadd (%p5536_p8), [#allocation7], 4294966784  ;;  %s4930_s7 = sand.u32 1, %s5532_s25  }
 0x2c0   : > { %s1062_s0 = scalar_lea.sflag [#allocation10], %s4930_s7 }
 0x2c4   : > { %s4933_s3 = sand.u32 1, %s5537_s27   ;;  %p5539_p0 = scmp.ne.s32.totalorder %s5538_s5, 0 }
 0x2c6   : > { %3973 = dma.done.wait (%p5539_p0), %s1062_s0, 32  }
 0x2c7   : > { %3975 = vsyncadd (%p5539_p0), %s1062_s0, 4294967264  ;;  %s2844_s6 = sshll.u32 %s4933_s3, 4  ;;  %s1078_s29 = scalar_lea.sflag [#allocation13], %s4930_s7 }
 0x2c8   : > { %s4944_s1 = scalar_lea.vmem [#allocation12], %s2844_s6 }
 0x2c9   : > { %3977 = dma.done.wait (%p5539_p0), %s1078_s29, 272  }
 0x2ca   : > { %3979 = vsyncadd (%p5539_p0), %s1078_s29, 4294967024  ;;  %s1095_s4 = scalar_lea.sflag [#allocation16], %s4930_s7  ;;  %s4952_s26 = scalar_lea.vmem [#allocation15], %s2844_s6 }
 0x2cb   : > { %3981 = dma.done.wait (%p5539_p0), %s1095_s4, 272  }
 0x2cc   : > { %3983 = vsyncadd (%p5539_p0), %s1095_s4, 4294967024  ;;  %s1112_s27 = scalar_lea.sflag [#allocation19], %s4930_s7  ;;  %s4960_s0 = scalar_lea.vmem [#allocation18], %s2844_s6 }
 0x2cd   : > { %3985 = dma.done.wait (%p5539_p0), %s1112_s27, 272  }
 0x2ce   : > { %3987 = vsyncadd (%p5539_p0), %s1112_s27, 4294967024  ;;  %s1129_s12 = scalar_lea.sflag [#allocation22], %s4930_s7  ;;  %s4968_s20 = scalar_lea.vmem [#allocation21], %s2844_s6 }
 0x2cf   : > { %3989 = dma.done.wait (%p5539_p0), %s1129_s12, 272  }
 0x2d0   : > { %3991 = vsyncadd (%p5539_p0), %s1129_s12, 4294967024  ;;  %s1146_s30 = scalar_lea.sflag [#allocation25], %s4930_s7 }
 0x2d1   : > { %3993 = dma.done.wait (%p5539_p0), %s1146_s30, 32  }
 0x2d2   : > { %3995 = vsyncadd (%p5539_p0), %s1146_s30, 4294967264  ;;  %s1156_s27 = scalar_lea.vmem [#allocation26], %s4933_s3  ;;  %s1162_s29 = scalar_lea.sflag [#allocation28], %s4930_s7 }
 0x2d3   : > { %s4983_s8 = scalar_lea.vmem [#allocation27], %s2844_s6 }
 0x2d4   : > { %3997 = dma.done.wait (%p5539_p0), %s1162_s29, 272  }
 0x2d5   : > { %3999 = vsyncadd (%p5539_p0), %s1162_s29, 4294967024  ;;  %s2849_s12 = sshll.u32 %s4933_s3, 6  ;;  %s1173_s4 = scalar_lea.vmem [#allocation29], %s4933_s3 }
 0x2d6   : > { %s1179_s2 = scalar_lea.sflag [#allocation31], %s4930_s7  ;;  %s4992_s30 = scalar_lea.vmem [#allocation30], %s2849_s12 }
 0x2d7   : > { %4001 = dma.done.wait (%p5539_p0), %s1179_s2, 1040  }
 0x2d8   : > { %4003 = vsyncadd (%p5539_p0), %s1179_s2, 4294966256  ;;  %s1190_s6 = scalar_lea.vmem [#allocation32], %s4933_s3  ;;  %p5540_p12 = pmov %p5535_p2 }
 0x2d9   : > { %p5541_p3 = pmov %p5535_p2 }
 0x2da   : > { %4005 = dma.done.wait (%p5540_p12), [#allocation34], 32  }
 0x2db   : > { %4007 = vsyncadd (%p5541_p3), [#allocation34], 4294967264  ;;  %p5542_p10 = pmov %p5535_p2 }
 0x2dc   : > { %p5543_p9 = pmov %p5535_p2 }
 0x2dd   : > { %4009 = dma.done.wait (%p5542_p10), [#allocation37], 272  }
 0x2de   : > { %4011 = vsyncadd (%p5543_p9), [#allocation37], 4294967024  ;;  %p5544_p1 = scmp.ne.s32.totalorder %s5532_s25, 0 }
 0x2df   : > { %v1334_v0 = vld [vmem:[#allocation8] sm:$0xff] (!%p5544_p1)  ;;  %v1335_v1 = vld [vmem:[#allocation8 + $0x8] sm:$0xff] (!%p5544_p1)  ;;  %v1336_v2 = vld [vmem:[#allocation6] sm:$0xf] (!%p5544_p1)  ;;  %s5009_s5 = smov (!%p5544_p1), 0  }
 0x2e0   : > { %1333 = sbr.rel (%p5544_p1) target bundleno = 969 (0x3c9), region = 208  ;;  %v1337_v3 = vld [vmem:[#allocation6 + $0x4] sm:$0xf] (!%p5544_p1)  ;;  %v1338_v4 = vld [vmem:[#allocation6 + $0x8] sm:$0xf] (!%p5544_p1) }
 0x2e1   : > { %v1339_v5 = vld [vmem:[#allocation6 + $0xc] sm:$0xf] (!%p5544_p1) }
 0x2e7 LB: >> { %v2858_v6 = vcombine.low %v1336_v2, %v1337_v3  ;;  %v4073_v7 = vmov 0.0   ;;  %vm4074_vm0 = vmmov 0   ;;  %v2859_v8 = vcombine.low %v1338_v4, %v1339_v5  ;;  %s2855_s25 = sshll.u32 %s4034_s5, 4  ;;  %s1345_s5 = sadd.s32 1, %s4034_s5   ;;  %s4034_s5 = sphi %s5009_s5, %s1345_s5  }
 0x2e8   : >> { %2955 = vmatprep.subr.bf16.mxu0 %v4073_v7  ;;  %2959 = vmatprep.mubr.msk.bf16.mxu0 %vm4074_vm0, %v4073_v7  ;;  %s1347_s7 = sshra.s32 %s2855_s25, 3  ;;  %vm1370_vm1 = vcmask 261120   ;;  %s1415_s12 = scalar_lea.vmem [#allocation2], %s2855_s25 }
 0x2e9   : >> { %2956 = vmatpush3.bf16.msra.mxu0 %v2858_v6  ;;  %s2856_s2 = sshll.u32 %s1347_s7, 2  ;;  %p1342_p6 = scmp.ge.s32.totalorder %s1345_s5, 2  }
 0x2ea   : >> { %2957 = vmatprep.subr.bf16.mxu0 %v4073_v7  ;;  %s1350_s29 = scalar_lea.vmem [#allocation3], %s2856_s2 }
 0x2eb   : >> { %v3237_v9 = vld [vmem:[%s1350_s29] sm:$0xff]  }
 0x2ed   : >> { %2958 = vmatpush3.bf16.msra.mxu0 %v2859_v8 }
 0x2f0   : >> { %2960 = vmatmul.mubr.msk.bf16.vlgmr.msra.gmra.mrb[0].mxu0 %vm1370_vm1, %v3237_v9 }
 0x3c2   : > { %1344 = sbr.rel (!%p1342_p6) target bundleno = 743 (0x2e7), region = 391 }
 0x3c3   : >> { %v1408_v10 = vpop.f32.mrb[0].mxu0 }
 0x3c4   : >> { %v1409_v11 = vadd.f32 %v1408_v10, %v1334_v0  ;;  %v2961_v12 = vpop.f32.mrb[1].mxu0 }
 0x3c5   : >> { %v1411_v13 = vpop.f32.mrb[2].mxu0 }
 0x3c6   : >> { %1416 = vst.msk [vmem:[%s1415_s12] sm:$0xff] %vm1370_vm1, %v1409_v11  ;;  %v1412_v14 = vadd.f32 %v1411_v13, %v1335_v1  ;;  %v2962_v15 = vpop.f32.mrb[3].mxu0 }
 0x3c8   : >> { %1417 = vst.msk [vmem:[%s1415_s12 + $0x8] sm:$0xff] %vm1370_vm1, %v1412_v14 }
 0x3c9 PF: > { %s5545_s7 = scalar_lea.vmem [#allocation9], %s4933_s3  ;;  %s5547_s5 = scalar_lea.vmem [#allocation11], %s4933_s3  ;;  %v5028_v19 = vld [vmem:[%s1156_s27] ss:$0 sm:$0xff]  ;;  %v5031_v20 = vld [vmem:[%s4944_s1] sm:$0xf] }
 0x3ca   : > { %v5016_v16 = vld [vmem:[%s5545_s7] ss:$0 sm:$0xff]  ;;  %s5549_s25 = scalar_lea.vmem [#allocation24], %s4933_s3  ;;  %5550 = vst [vmem:[#allocation61_spill] sm:$0xff] %v5031_v20  ;;  %v5034_v21 = vld [vmem:[%s4944_s1 + $0x4] sm:$0xf] }
 0x3cb   : > { %5546 = vst [vmem:[#allocation59_spill] sm:$0xff] %v5016_v16  ;;  %v5020_v17 = vld [vmem:[%s5547_s5] ss:$0 sm:$0xff]  ;;  %5551 = vst [vmem:[#allocation62_spill] sm:$0xff] %v5034_v21  ;;  %v5037_v22 = vld [vmem:[%s4944_s1 + $0x8] sm:$0xf] }
 0x3cc   : > { %5548 = vst [vmem:[#allocation60_spill] sm:$0xff] %v5020_v17  ;;  %v5024_v18 = vld [vmem:[%s5549_s25] ss:$0 sm:$0xff]  ;;  %5552 = vst [vmem:[#allocation63_spill] sm:$0xff] %v5037_v22  ;;  %s5553_s2 = scalar_lea.vmem [#allocation14], %s4933_s3  ;;  %s5554_s27 = scalar_lea.vmem [#allocation17], %s4933_s3 }
 0x3cd   : > { %v5040_v23 = vld [vmem:[%s4944_s1 + $0xc] sm:$0xf]  ;;  %v5047_v25 = vld [vmem:[%s4952_s26] sm:$0xf]  ;;  %v5050_v26 = vld [vmem:[%s4952_s26 + $0x4] sm:$0xf] }
 0x3ce   : > { %v5044_v24 = vld [vmem:[%s5553_s2] ss:$0 sm:$0xff]  ;;  %v5056_v28 = vld [vmem:[%s4952_s26 + $0xc] sm:$0xf]  ;;  %v5063_v30 = vld [vmem:[%s4960_s0] sm:$0xf] }
 0x3cf   : > { %v5053_v27 = vld [vmem:[%s4952_s26 + $0x8] sm:$0xf]  ;;  %v5072_v33 = vld [vmem:[%s4960_s0 + $0xc] sm:$0xf]  ;;  %s5555_s1 = scalar_lea.vmem [#allocation20], %s4933_s3  ;;  %s5556_s26 = scalar_lea.vmem [#allocation23], %s4933_s3 }
 0x3d0   : > { %v5060_v29 = vld [vmem:[%s5554_s27] ss:$0 sm:$0xff]  ;;  %v5066_v31 = vld [vmem:[%s4960_s0 + $0x4] sm:$0xf]  ;;  %v5085_v37 = vld [vmem:[%s4968_s20 + $0x8] sm:$0xf] }
 0x3d1   : > { %v5069_v32 = vld [vmem:[%s4960_s0 + $0x8] sm:$0xf]  ;;  %v5079_v35 = vld [vmem:[%s4968_s20] sm:$0xf]  ;;  %v5088_v38 = vld [vmem:[%s4968_s20 + $0xc] sm:$0xf] }
 0x3d2   : > { %v5076_v34 = vld [vmem:[%s5555_s1] ss:$0 sm:$0xff]  ;;  %v5098_v41 = vld [vmem:[%s4983_s8 + $0x4] sm:$0xf]  ;;  %v5101_v42 = vld [vmem:[%s4983_s8 + $0x8] sm:$0xf] }
 0x3d3   : > { %v5082_v36 = vld [vmem:[%s4968_s20 + $0x4] sm:$0xf]  ;;  %v5104_v43 = vld [vmem:[%s4983_s8 + $0xc] sm:$0xf]  ;;  %v5111_v45 = vld [vmem:[%s4992_s30] sm:$0xf] }
 0x3d4   : > { %v5092_v39 = vld [vmem:[%s5556_s26] ss:$0 sm:$0xff]  ;;  %v5114_v46 = vld [vmem:[%s4992_s30 + $0x4] sm:$0xf]  ;;  %v5117_v47 = vld [vmem:[%s4992_s30 + $0x8] sm:$0xf] }
 0x3d5   : > { %v5095_v40 = vld [vmem:[%s4983_s8] sm:$0xf]  ;;  %v5126_v50 = vld [vmem:[%s4992_s30 + $0x14] sm:$0xf]  ;;  %v5129_v51 = vld [vmem:[%s4992_s30 + $0x18] sm:$0xf] }
 0x3d6   : > { %v5108_v44 = vld [vmem:[%s1173_s4] ss:$0 sm:$0xff]  ;;  %v5120_v48 = vld [vmem:[%s4992_s30 + $0xc] sm:$0xf]  ;;  %v5123_v49 = vld [vmem:[%s4992_s30 + $0x10] sm:$0xf] }
 0x3d7   : > { %v5132_v52 = vld [vmem:[%s4992_s30 + $0x1c] sm:$0xf]  ;;  %v5135_v53 = vld [vmem:[%s4992_s30 + $0x20] sm:$0xf]  ;;  %v5138_v54 = vld [vmem:[%s4992_s30 + $0x24] sm:$0xf] }
 0x3d8   : > { %v5141_v55 = vld [vmem:[%s4992_s30 + $0x28] sm:$0xf]  ;;  %v5144_v56 = vld [vmem:[%s4992_s30 + $0x2c] sm:$0xf]  ;;  %v5147_v57 = vld [vmem:[%s4992_s30 + $0x30] sm:$0xf] }
 0x3d9   : > { %v5150_v58 = vld [vmem:[%s4992_s30 + $0x34] sm:$0xf]  ;;  %v5153_v59 = vld [vmem:[%s4992_s30 + $0x38] sm:$0xf]  ;;  %v5156_v60 = vld [vmem:[%s4992_s30 + $0x3c] sm:$0xf] }
 0x3da   : > { %v5160_v61 = vld [vmem:[%s1190_s6] ss:$0 sm:$0xff]  ;;  %s5162_s8 = smov 0  }
 0x3db LB: >> { %v5557_v17 = vld [vmem:[#allocation60_spill] sm:$0xff]  ;;  %v5558_v16 = vld [vmem:[#allocation59_spill] sm:$0xff]  ;;  %s2861_s20 = sshll.u32 %s4038_s8, 4  ;;  %vm1474_vm2 = vcmask 261120   ;;  %v5559_v21 = vld [vmem:[#allocation62_spill] sm:$0xff]  ;;  %v5471_v13 = vmov 0.0   ;;  %s4038_s8 = sphi %s5162_s8, %s1469_s8  }
 0x3dc   : >> { %s5168_s0 = scalar_lea.vmem [#allocation2], %s2861_s20  ;;  %v5560_v20 = vld [vmem:[#allocation61_spill] sm:$0xff]  ;;  %2963 = vmatprep.subr.bf16.mxu0 %v5471_v13  ;;  %vm4076_vm3 = vmmov 0   ;;  %v5561_v22 = vld [vmem:[#allocation63_spill] sm:$0xff]  ;;  %2987 = vmatprep.subr.bf16.mxu1 %v5471_v13  ;;  %s4077_s3 = smov 112   ;;  %vm1702_vm4 = vcmask 130048  }
 0x3dd   : >> { %v5171_v62 = vld [vmem:[%s5168_s0] sm:$0xff]  ;;  %v5174_v63 = vld [vmem:[%s5168_s0 + $0x8] sm:$0xff]  ;;  %v2865_v12 = vcombine.low %v5560_v20, %v5559_v21  ;;  %2967 = vmatprep.mubr.msk.bf16.mxu0 %vm4076_vm3, %v5471_v13  ;;  %v2866_v14 = vcombine.low %v5561_v22, %v5040_v23  ;;  %2989 = vmatprep.mubr.msk.bf16.mxu1 %vm4076_vm3, %v5471_v13  ;;  %s4078_s4 = smov 16   ;;  %s1469_s8 = sadd.s32 1, %s4038_s8  }
 0x3de   : >> { %v1475_v0 = vsel %vm1474_vm2, %v5171_v62, 0.0  ;;  %v1478_v1 = vsel %vm1474_vm2, %v5174_v63, 0.0  ;;  %p1466_p7 = scmp.ge.s32.totalorder %s1469_s8, 2  }
 0x3df   : >> { %1476 = vadd.xlane.f32.xlu0 %v1475_v0  ;;  %2964 = vmatpush3.bf16.msra.mxu0 %v2865_v12  ;;  %s5563_s30 = sld [smem:[#allocation54_spill]] (%p1466_p7) }
 0x3e0   : >> { %2965 = vmatprep.subr.bf16.mxu0 %v5471_v13 }
 0x3e3   : >> { %1479 = vadd.xlane.f32.xlu0 %v1478_v1  ;;  %2966 = vmatpush3.bf16.msra.mxu0 %v2866_v14 }
 0x3e4   : >> { %2971 = vmatprep.subr.bf16.mxu0 %v5471_v13 }
 0x3e5   : > { %p2899_p4 = scmp.ne.s32.totalorder (%p1466_p7), %s5563_s30, 1 }
 0x46c   : >> { %v1477_v2 = vpop.xlane.xlu0 %1476 }
 0x46d   : >> { %v1482_v3 = vmul.f32 0.03125, %v1477_v2 }
 0x46f   : >> { %v1484_v4 = vsub.f32 %v5171_v62, %v1482_v3 }
 0x470   : >> { %v1480_v5 = vpop.xlane.xlu0 %1479 }
 0x471   : >> { %v1483_v6 = vmul.f32 0.03125, %v1480_v5  ;;  %v1486_v7 = vmul.f32 %v1484_v4, %v1484_v4 }
 0x473   : >> { %v1485_v8 = vsub.f32 %v5174_v63, %v1483_v6  ;;  %v1488_v9 = vsel %vm1474_vm2, %v1486_v7, 0.0 }
 0x474   : >> { %1489 = vadd.xlane.f32.xlu1 %v1488_v9 }
 0x475   : >> { %v1487_v10 = vmul.f32 %v1485_v8, %v1485_v8 }
 0x477   : >> { %v1491_v11 = vsel %vm1474_vm2, %v1487_v10, 0.0 }
 0x478   : >> { %1492 = vadd.xlane.f32.xlu1 %v1491_v11 }
 0x501   : >> { %v1490_v15 = vpop.xlane.xlu1 %1489 }
 0x502   : >> { %v1494_v0 = vmul.f32 0.03125, %v1490_v15  ;;  %v2869_v15 = vcombine.low %v5047_v25, %v5050_v26 }
 0x504   : >> { %v1496_v1 = vadd.f32 1e-05, %v1494_v0 }
 0x505   : >> { %v1493_v2 = vpop.xlane.xlu1 %1492 }
 0x506   : >> { %3238 = vrsqrt.f32 %v1496_v1  ;;  %v1495_v3 = vmul.f32 0.03125, %v1493_v2  ;;  %v5562_v1 = vmov 0.0  }
 0x508   : >> { %v1497_v5 = vadd.f32 1e-05, %v1495_v3 }
 0x50a   : >> { %3240 = vrsqrt.f32 %v1497_v5 }
 0x510   : >> { %v3239_v6 = vpop.eup %3238 }
 0x511   : >> { %v1500_v7 = vmul.f32 %v3239_v6, %v1484_v4  ;;  %v2870_v4 = vcombine.low %v5053_v27, %v5056_v28 }
 0x513   : >> { %v1508_v11 = vmul.f32 %v5558_v16, %v1500_v7 }
 0x514   : >> { %v3241_v9 = vpop.eup %3240 }
 0x515   : >> { %v1501_v10 = vmul.f32 %v3241_v9, %v1485_v8  ;;  %v1516_v14 = vadd.f32 %v5557_v17, %v1508_v11  ;;  %v2873_v8 = vcombine.low %v5063_v30, %v5066_v31 }
 0x517   : >> { %v1509_v12 = vmul.f32 %v5558_v16, %v1501_v10 }
 0x519   : >> { %v1517_v13 = vadd.f32 %v5557_v17, %v1509_v12 }
 0x51b   : >> { %v1518_v0 = vpack.c.bf16 %v1517_v13, %v1516_v14  ;;  %v2874_v13 = vcombine.low %v5069_v32, %v5072_v33 }
 0x51d   : >> { %2968 = vmatmul.mubr.msk.bf16.vlgmr.msra.gmra.mrb[0].mxu0 %vm1474_vm2, %v1518_v0 }
 0x51e   : >> { %2972 = vmatpush3.bf16.msra.mxu0 %v2869_v15  ;;  %2975 = vmatprep.mubr.msk.bf16.mxu0 %vm4076_vm3, %v5562_v1 }
 0x51f   : >> { %2973 = vmatprep.subr.bf16.mxu0 %v5562_v1 }
 0x522   : >> { %2974 = vmatpush3.bf16.msra.mxu0 %v2870_v4 }
 0x523   : >> { %2979 = vmatprep.subr.bf16.mxu0 %v5562_v1 }
 0x525   : >> { %2976 = vmatmul.mubr.msk.bf16.vlgmr.msra.gmra.mrb[4].mxu0 %vm1474_vm2, %v1518_v0 }
 0x526   : >> { %2980 = vmatpush3.bf16.msra.mxu0 %v2873_v8  ;;  %2983 = vmatprep.mubr.msk.bf16.mxu0 %vm4076_vm3, %v5562_v1 }
 0x527   : >> { %2981 = vmatprep.subr.bf16.mxu0 %v5562_v1 }
 0x52a   : >> { %2982 = vmatpush3.bf16.msra.mxu0 %v2874_v13 }
 0x52b   : >> { %2993 = vmatprep.subr.bf16.mxu0 %v5562_v1 }
 0x52d   : >> { %2984 = vmatmul.mubr.msk.bf16.vlgmr.msra.gmra.mrb[8].mxu0 %vm1474_vm2, %v1518_v0 }
 0x52e   : >> { %2995 = vmatprep.mubr.msk.bf16.mxu0 %vm4076_vm3, %v5562_v1 }
 0x5f0   : >> { %v1574_v2 = vpop.f32.mrb[0].mxu0 }
 0x5f1   : >> { %v2969_v3 = vpop.f32.mrb[1].mxu0  ;;  %v1575_v6 = vadd.f32 %v5044_v24, %v1574_v2 }
 0x5f2   : >> { %v1577_v5 = vpop.f32.mrb[2].mxu0 }
 0x5f3   : >> { %v1578_v7 = vadd.f32 %v5044_v24, %v1577_v5  ;;  %v2970_v9 = vpop.f32.mrb[3].mxu0 }
 0x5f5   : >> { %v1581_v10 = vpack.c.bf16 %v1578_v7, %v1575_v6 }
 0x5f7   : >> { %1821 = vrot.lane.b32.xlu1 %v1581_v10, %s4077_s3 }
 0x5f8   : >> { %v1634_v11 = vpop.f32.mrb[4].mxu0 }
 0x5f9   : >> { %v2977_v12 = vpop.f32.mrb[5].mxu0  ;;  %v1635_v15 = vadd.f32 %v5060_v29, %v1634_v11 }
 0x5fa   : >> { %v1637_v14 = vpop.f32.mrb[6].mxu0 }
 0x5fb   : >> { %v1638_v0 = vadd.f32 %v5060_v29, %v1637_v14  ;;  %v2978_v4 = vpop.f32.mrb[7].mxu0 }
 0x5fd   : >> { %v1641_v8 = vpack.c.bf16 %v1638_v0, %v1635_v15 }
 0x5ff   : >> { %1824 = vrot.lane.b32.xlu0 %v1641_v8, %s4077_s3  ;;  %v1707_v13 = vsel %vm1702_vm4, %v1641_v8, 0 }
 0x600   : >> { %v1694_v2 = vpop.f32.mrb[8].mxu0  ;;  %2988 = vmatpush3.bf16.xpose.msra.mxu1 %v1707_v13 }
 0x601   : >> { %v2985_v3 = vpop.f32.mrb[9].mxu0  ;;  %2999 = vmatprep.subr.bf16.mxu1 %v5562_v1  ;;  %v1695_v6 = vadd.f32 %v5076_v34, %v1694_v2 }
 0x602   : >> { %v1697_v5 = vpop.f32.mrb[10].mxu0 }
 0x603   : >> { %v1698_v7 = vadd.f32 %v5076_v34, %v1697_v5  ;;  %v2986_v9 = vpop.f32.mrb[11].mxu0 }
 0x605   : >> { %v1701_v11 = vpack.c.bf16 %v1698_v7, %v1695_v6 }
 0x607   : >> { %2990 = vmatmul.mubr.msk.bf16.vlgmr.msra.gmra.mrb[0].mxu1 %vm1702_vm4, %v1581_v10  ;;  %2994 = vmatpush3.bf16.msra.mxu0 %v1701_v11 }
 0x608   : >> { %3001 = vmatprep.mubr.msk.bf16.mxu1 %vm4076_vm3, %v5562_v1  ;;  %3005 = vmatprep.subr.bf16.mxu0 %v5562_v1 }
 0x669   : >> { %v1822_v15 = vpop.permute.xlu1 %1821 }
 0x671   : >> { %v1825_v12 = vpop.permute.xlu0 %1824 }
 0x672   : >> { %v1830_v14 = vsel %vm1702_vm4, %v1825_v12, 0 }
 0x673   : >> { %3000 = vmatpush3.bf16.xpose.msra.mxu1 %v1830_v14 }
 0x674   : >> { %3011 = vmatprep.subr.bf16.mxu1 %v5562_v1 }
 0x67a   : >> { %3002 = vmatmul.mubr.msk.bf16.vlgmr.msra.gmra.mrb[4].mxu1 %vm1702_vm4, %v1822_v15 }
 0x67b   : >> { %3015 = vmatprep.mubr.msk.bf16.mxu1 %vm4076_vm3, %v5562_v1 }
 0x6da   : >> { %v1743_v0 = vpop.f32.mrb[0].mxu1 }
 0x6db   : >> { %v1750_v10 = vmul.f32 0.25, %v1743_v0  ;;  %v2991_v4 = vpop.f32.mrb[1].mxu1 }
 0x6dc   : >> { %v1746_v8 = vpop.f32.mrb[2].mxu1 }
 0x6dd   : >> { %v1751_v13 = vmul.f32 0.25, %v1746_v8  ;;  %v2992_v2 = vpop.f32.mrb[3].mxu1  ;;  %v1752_v3 = vsel %vm1702_vm4, %v1750_v10, -inf }
 0x6de   : >> { %1753 = vmax.xlane.f32.xlu1 %v1752_v3 }
 0x6df   : >> { %v1755_v5 = vsel %vm1702_vm4, %v1751_v13, -inf }
 0x6e0   : >> { %1756 = vmax.xlane.f32.xlu0 %v1755_v5 }
 0x74d   : >> { %v1866_v6 = vpop.f32.mrb[4].mxu1 }
 0x74e   : >> { %v1873_v7 = vmul.f32 0.25, %v1866_v6  ;;  %v3003_v9 = vpop.f32.mrb[5].mxu1 }
 0x74f   : >> { %v1869_v12 = vpop.f32.mrb[6].mxu1 }
 0x750   : >> { %v1874_v14 = vmul.f32 0.25, %v1869_v12  ;;  %v3004_v15 = vpop.f32.mrb[7].mxu1  ;;  %v1875_v16 = vsel %vm1702_vm4, %v1873_v7, -inf }
 0x751   : >> { %1876 = vmax.xlane.f32.xlu0 %v1875_v16 }
 0x752   : >> { %v1878_v0 = vsel %vm1702_vm4, %v1874_v14, -inf }
 0x753   : >> { %1879 = vmax.xlane.f32.xlu1 %v1878_v0 }
 0x76b   : >> { %v1754_v4 = vpop.xlane.xlu1 %1753 }
 0x76c   : >> { %v1758_v8 = vsub.f32 %v1750_v10, %v1754_v4 }
 0x76d   : >> { %v1757_v2 = vpop.xlane.xlu0 %1756 }
 0x76e   : >> { %v1760_v17 = vmul.f32 1.442695, %v1758_v8  ;;  %v1759_v3 = vsub.f32 %v1751_v13, %v1757_v2 }
 0x770   : >> { %3242 = vpow2.f32 %v1760_v17  ;;  %v1762_v20 = vmul.f32 1.442695, %v1759_v3 }
 0x772   : >> { %3244 = vpow2.f32 %v1762_v20 }
 0x77a   : >> { %v3243_v5 = vpop.eup %3242 }
 0x77b   : >> { %v1764_v6 = vsel %vm1702_vm4, %v3243_v5, 0.0 }
 0x77c   : >> { %v3245_v9 = vpop.eup %3244  ;;  %1765 = vadd.xlane.f32.xlu0 %v1764_v6 }
 0x77d   : >> { %v1767_v12 = vsel %vm1702_vm4, %v3245_v9, 0.0 }
 0x77e   : >> { %1768 = vadd.xlane.f32.xlu1 %v1767_v12 }
 0x7de   : >> { %v1877_v16 = vpop.xlane.xlu0 %1876 }
 0x7df   : >> { %v1881_v15 = vsub.f32 %v1873_v7, %v1877_v16 }
 0x7e0   : >> { %v1880_v21 = vpop.xlane.xlu1 %1879 }
 0x7e1   : >> { %v1883_v0 = vmul.f32 1.442695, %v1881_v15  ;;  %v1882_v22 = vsub.f32 %v1874_v14, %v1880_v21 }
 0x7e3   : >> { %3246 = vpow2.f32 %v1883_v0  ;;  %v1885_v10 = vmul.f32 1.442695, %v1882_v22 }
 0x7e5   : >> { %3248 = vpow2.f32 %v1885_v10 }
 0x7ed   : >> { %v3247_v13 = vpop.eup %3246 }
 0x7ee   : >> { %v1887_v17 = vsel %vm1702_vm4, %v3247_v13, 0.0 }
 0x7ef   : >> { %v3249_v20 = vpop.eup %3248  ;;  %1888 = vadd.xlane.f32.xlu0 %v1887_v17  ;;  %v2881_v17 = vcombine.low %v5085_v37, %v5088_v38 }
 0x7f0   : >> { %v1890_v4 = vsel %vm1702_vm4, %v3249_v20, 0.0 }
 0x7f1   : >> { %1891 = vadd.xlane.f32.xlu1 %v1890_v4 }
 0x805   : >> { %1899 = vrot.lane.b32.xlu0 %v1701_v11, %s4077_s3 }
 0x809   : >> { %v1766_v8 = vpop.xlane.xlu0 %1765 }
 0x80a   : >> { %3250 = vrcp.f32 %v1766_v8 }
 0x80b   : >> { %v1769_v2 = vpop.xlane.xlu1 %1768 }
 0x80c   : >> { %3252 = vrcp.f32 %v1769_v2 }
 0x814   : >> { %v3251_v7 = vpop.eup %3250 }
 0x815   : >> { %v1771_v21 = vmul.f32 %v3251_v7, %v3243_v5 }
 0x816   : >> { %v3253_v3 = vpop.eup %3252 }
 0x817   : >> { %v1773_v14 = vmul.f32 %v3253_v3, %v3245_v9  ;;  %v2880_v9 = vcombine.low %v5079_v35, %v5082_v36 }
 0x819   : >> { %v1774_v22 = vpack.c.bf16 %v1773_v14, %v1771_v21  ;;  %3012 = vmatpush3.bf16.msra.mxu1 %v2880_v9 }
 0x81a   : >> { %3013 = vmatprep.subr.bf16.mxu1 %v5562_v1 }
 0x81b   : >> { %2996 = vmatmul.mubr.msk.bf16.vlgmr.msra.gmra.mrb[12].mxu0 %vm1702_vm4, %v1774_v22 }
 0x81c   : >> { %3007 = vmatprep.mubr.msk.bf16.mxu0 %vm4076_vm3, %v5562_v1 }
 0x81d   : >> { %3014 = vmatpush3.bf16.msra.mxu1 %v2881_v17 }
 0x81e   : >> { %3027 = vmatprep.subr.bf16.mxu1 %v5562_v1 }
 0x87c   : >> { %v1889_v6 = vpop.xlane.xlu0 %1888 }
 0x87d   : >> { %3254 = vrcp.f32 %v1889_v6 }
 0x87e   : >> { %v1892_v12 = vpop.xlane.xlu1 %1891 }
 0x87f   : >> { %3256 = vrcp.f32 %v1892_v12 }
 0x880   : >> { %v1900_v16 = vpop.permute.xlu0 %1899 }
 0x881   : >> { %3006 = vmatpush3.bf16.msra.mxu0 %v1900_v16 }
 0x882   : >> { %3019 = vmatprep.subr.bf16.mxu0 %v5562_v1 }
 0x887   : >> { %v3255_v11 = vpop.eup %3254 }
 0x888   : >> { %v1894_v0 = vmul.f32 %v3255_v11, %v3247_v13 }
 0x889   : >> { %v3257_v15 = vpop.eup %3256 }
 0x88a   : >> { %v1896_v10 = vmul.f32 %v3257_v15, %v3249_v20 }
 0x88c   : >> { %v1897_v5 = vpack.c.bf16 %v1896_v10, %v1894_v0 }
 0x88e   : >> { %3008 = vmatmul.mubr.msk.bf16.vlgmr.msra.gmra.mrb[16].mxu0 %vm1702_vm4, %v1897_v5 }
 0x88f   : >> { %3023 = vmatprep.mubr.msk.bf16.mxu0 %vm4076_vm3, %v5562_v1 }
 0x8ee   : >> { %v1812_v13 = vpop.f32.mrb[12].mxu0 }
 0x8ef   : >> { %v2997_v20 = vpop.f32.mrb[13].mxu0 }
 0x8f0   : >> { %v1815_v4 = vpop.f32.mrb[14].mxu0 }
 0x8f1   : >> { %v1819_v8 = vpack.c.bf16 %v1815_v4, %v1812_v13  ;;  %v2998_v2 = vpop.f32.mrb[15].mxu0 }
 0x961   : >> { %v1939_v7 = vpop.f32.mrb[16].mxu0 }
 0x962   : >> { %v3009_v3 = vpop.f32.mrb[17].mxu0 }
 0x963   : >> { %v1942_v21 = vpop.f32.mrb[18].mxu0 }
 0x964   : >> { %v1946_v14 = vpack.c.bf16 %v1942_v21, %v1939_v7  ;;  %v3010_v22 = vpop.f32.mrb[19].mxu0 }
 0x966   : >> { %1948 = vrot.lane.b32.xlu1 %v1946_v14, %s4078_s4 }
 0x9d8   : >> { %v1949_v6 = vpop.permute.xlu1 %1948 }
 0x9d9   : >> { %v1952_v12 = vsel %vm1702_vm4, %v1819_v8, %v1949_v6  ;;  %v2887_v6 = vcombine.low %v5095_v40, %v5098_v41 }
 0x9da   : >> { %3016 = vmatmul.mubr.msk.bf16.vlgmr.msra.gmra.mrb[8].mxu1 %vm1474_vm2, %v1952_v12  ;;  %v2888_v12 = vcombine.low %v5101_v42, %v5104_v43 }
 0x9db   : >> { %3043 = vmatprep.mubr.msk.bf16.mxu1 %vm4076_vm3, %v5562_v1  ;;  %3020 = vmatpush3.bf16.msra.mxu0 %v2887_v6 }
 0x9dc   : >> { %3021 = vmatprep.subr.bf16.mxu0 %v5562_v1 }
 0x9df   : >> { %3022 = vmatpush3.bf16.msra.mxu0 %v2888_v12 }
 0xaad   : >> { %v2001_v16 = vpop.f32.mrb[8].mxu1 }
 0xaae   : >> { %v2008_v11 = vadd.f32 %v2001_v16, %v5171_v62  ;;  %v3017_v15 = vpop.f32.mrb[9].mxu1  ;;  %v2890_v16 = vcombine.low %v5111_v45, %v5114_v46 }
 0xaaf   : >> { %v2004_v0 = vpop.f32.mrb[10].mxu1  ;;  %v2892_v15 = vcombine.low %v5123_v49, %v5126_v50 }
 0xab0   : >> { %v5268_v10 = vadd.f32 %v5092_v39, %v2008_v11  ;;  %v2009_v5 = vadd.f32 %v2004_v0, %v5174_v63  ;;  %v3018_v9 = vpop.f32.mrb[11].mxu1  ;;  %3028 = vmatpush3.bf16.msra.mxu1 %v2890_v16  ;;  %v2891_v11 = vcombine.low %v5117_v47, %v5120_v48  ;;  %v2893_v0 = vcombine.low %v5129_v51, %v5132_v52 }
 0xab1   : >> { %3029 = vmatprep.subr.bf16.mxu1 %v5562_v1  ;;  %v2895_v9 = vcombine.low %v5141_v55, %v5144_v56 }
 0xab2   : >> { %v5272_v17 = vadd.f32 %v5092_v39, %v2009_v5  ;;  %v2018_v13 = vsel %vm1474_vm2, %v5268_v10, 0.0  ;;  %v2894_v5 = vcombine.low %v5135_v53, %v5138_v54 }
 0xab3   : >> { %2019 = vadd.xlane.f32.xlu1 %v2018_v13 }
 0xab4   : >> { %v2021_v20 = vsel %vm1474_vm2, %v5272_v17, 0.0  ;;  %3030 = vmatpush3.bf16.msra.mxu1 %v2891_v11 }
 0xab5   : >> { %2022 = vadd.xlane.f32.xlu0 %v2021_v20  ;;  %3031 = vmatprep.subr.bf16.mxu1 %v5562_v1 }
 0xab8   : >> { %3032 = vmatpush3.bf16.msra.mxu1 %v2892_v15 }
 0xab9   : >> { %3033 = vmatprep.subr.bf16.mxu1 %v5562_v1 }
 0xabc   : >> { %3034 = vmatpush3.bf16.msra.mxu1 %v2893_v0  ;;  %v2896_v0 = vcombine.low %v5147_v57, %v5150_v58 }
 0xabd   : >> { %3035 = vmatprep.subr.bf16.mxu1 %v5562_v1 }
 0xac0   : >> { %3036 = vmatpush3.bf16.msra.mxu1 %v2894_v5 }
 0xac1   : >> { %3037 = vmatprep.subr.bf16.mxu1 %v5562_v1 }
 0xac4   : >> { %3038 = vmatpush3.bf16.msra.mxu1 %v2895_v9 }
 0xac5   : >> { %3039 = vmatprep.subr.bf16.mxu1 %v5562_v1 }
 0xac8   : >> { %3040 = vmatpush3.bf16.msra.mxu1 %v2896_v0 }
 0xac9   : >> { %3041 = vmatprep.subr.bf16.mxu1 %v5562_v1 }
 0xb40   : >> { %v2020_v62 = vpop.xlane.xlu1 %2019 }
 0xb41   : >> { %v2024_v4 = vmul.f32 0.03125, %v2020_v62 }
 0xb42   : >> { %v2023_v8 = vpop.xlane.xlu0 %2022 }
 0xb43   : >> { %v2026_v2 = vsub.f32 %v5268_v10, %v2024_v4  ;;  %v2025_v7 = vmul.f32 0.03125, %v2023_v8 }
 0xb45   : >> { %v2027_v63 = vsub.f32 %v5272_v17, %v2025_v7  ;;  %v2028_v3 = vmul.f32 %v2026_v2, %v2026_v2 }
 0xb47   : >> { %v2030_v21 = vsel %vm1474_vm2, %v2028_v3, 0.0  ;;  %v2029_v14 = vmul.f32 %v2027_v63, %v2027_v63 }
 0xb48   : >> { %2031 = vadd.xlane.f32.xlu0 %v2030_v21 }
 0xb49   : >> { %v2033_v22 = vsel %vm1474_vm2, %v2029_v14, 0.0 }
 0xb4a   : >> { %2034 = vadd.xlane.f32.xlu1 %v2033_v22 }
 0xbd5   : >> { %v2032_v13 = vpop.xlane.xlu0 %2031 }
 0xbd6   : >> { %v2036_v20 = vmul.f32 0.03125, %v2032_v13 }
 0xbd7   : >> { %v2035_v62 = vpop.xlane.xlu1 %2034 }
 0xbd8   : >> { %v2038_v4 = vadd.f32 1e-05, %v2036_v20  ;;  %v2037_v8 = vmul.f32 0.03125, %v2035_v62 }
 0xbda   : >> { %3258 = vrsqrt.f32 %v2038_v4  ;;  %v2039_v7 = vadd.f32 1e-05, %v2037_v8 }
 0xbdc   : >> { %3260 = vrsqrt.f32 %v2039_v7 }
 0xbe4   : >> { %v3259_v3 = vpop.eup %3258 }
 0xbe5   : >> { %v2042_v21 = vmul.f32 %v3259_v3, %v2026_v2  ;;  %v2897_v2 = vcombine.low %v5153_v59, %v5156_v60 }
 0xbe6   : >> { %v3261_v14 = vpop.eup %3260 }
 0xbe7   : >> { %v2050_v22 = vmul.f32 %v5024_v18, %v2042_v21  ;;  %v2043_v6 = vmul.f32 %v3261_v14, %v2027_v63  ;;  %3042 = vmatpush3.bf16.msra.mxu1 %v2897_v2 }
 0xbe9   : >> { %v2051_v12 = vmul.f32 %v5024_v18, %v2043_v6  ;;  %v2058_v16 = vadd.f32 %v5028_v19, %v2050_v22 }
 0xbeb   : >> { %v2059_v11 = vadd.f32 %v5028_v19, %v2051_v12 }
 0xbed   : >> { %v2060_v15 = vpack.c.bf16 %v2059_v11, %v2058_v16 }
 0xbef   : >> { %3024 = vmatmul.mubr.msk.bf16.vlgmr.msra.gmra.mrb[20].mxu0 %vm1474_vm2, %v2060_v15 }
 0xcc2   : >> { %v2116_v63 = vpop.f32.mrb[20].mxu0 }
 0xcc3   : >> { %v2117_v5 = vadd.f32 %v5108_v44, %v2116_v63  ;;  %v3025_v9 = vpop.f32.mrb[21].mxu0 }
 0xcc4   : >> { %v2119_v13 = vpop.f32.mrb[22].mxu0 }
 0xcc5   : >> { %v2120_v20 = vadd.f32 %v5108_v44, %v2119_v13  ;;  %v3026_v62 = vpop.f32.mrb[23].mxu0  ;;  %v2123_v4 = vmax.f32 %v2117_v5, 0.0 }
 0xcc7   : >> { %v2124_v8 = vmax.f32 %v2120_v20, 0.0 }
 0xcc9   : >> { %v2125_v7 = vpack.c.bf16 %v2124_v8, %v2123_v4 }
 0xccb   : >> { %3044 = vmatmul.mubr.bf16.vlgmr.msra.gmra.mrb[12].mxu1 %v2125_v7 }
 0xd9e   : >> { %v2208_v3 = vpop.f32.mrb[12].mxu1 }
 0xd9f   : >> { %v2215_v1 = vadd.f32 %v2208_v3, %v5268_v10  ;;  %v3045_v21 = vpop.f32.mrb[13].mxu1  ;;  %1468 = sbr.rel (!%p1466_p7) target bundleno = 987 (0x3db), region = 402 }
 0xda0   : >> { %v2211_v14 = vpop.f32.mrb[14].mxu1 }
 0xda1   : >> { %v2223_v22 = vadd.f32 %v5160_v61, %v2215_v1  ;;  %v2216_v6 = vadd.f32 %v2211_v14, %v5272_v17  ;;  %v3046_v12 = vpop.f32.mrb[15].mxu1 }
 0xda3   : >> { %2225 = vst.msk [vmem:[%s5168_s0] sm:$0xff] %vm1474_vm2, %v2223_v22  ;;  %v2224_v16 = vadd.f32 %v5160_v61, %v2216_v6 }
 0xda5   : >> { %2226 = vst.msk [vmem:[%s5168_s0 + $0x8] sm:$0xff] %vm1474_vm2, %v2224_v16 }
 0xda6   : > { %2230 = sbr.rel (%p2899_p4) target bundleno = 4040 (0xfc8), region = 226  ;;  %v5329_v10 = vld [vmem:[#allocation33] ss:$0 sm:$0xff] (!%p2899_p4)  ;;  %v5331_v11 = vld [vmem:[#allocation35] ss:$0 sm:$0xff] (!%p2899_p4)  ;;  %s5343_s6 = smov (!%p2899_p4), 0  }
 0xda7   : > { %v5333_v17 = vld [vmem:[#allocation36] sm:$0xf] (!%p2899_p4)  ;;  %v5335_v15 = vld [vmem:[#allocation36 + $0x4] sm:$0xf] (!%p2899_p4)  ;;  %v5337_v0 = vld [vmem:[#allocation36 + $0x8] sm:$0xf] (!%p2899_p4) }
 0xda8   : > { %v5339_v2 = vld [vmem:[#allocation36 + $0xc] sm:$0xf] (!%p2899_p4)  ;;  %v5341_v63 = vld [vmem:[#allocation38] ss:$0 sm:$0xff] (!%p2899_p4) }
 0xdad LB: >> { %s2900_s29 = sshll.u32 %s4042_s6, 4  ;;  %v2904_v35 = vcombine.low %v5333_v17, %v5335_v15  ;;  %v4079_v36 = vmov 0.0   ;;  %vm4080_vm5 = vmmov 0   ;;  %v2905_v37 = vcombine.low %v5337_v0, %v5339_v2  ;;  %s2243_s6 = sadd.s32 1, %s4042_s6   ;;  %s4042_s6 = sphi %s5343_s6, %s2243_s6  }
 0xdae   : >> { %s2245_s12 = scalar_lea.vmem [#allocation2], %s2900_s29  ;;  %3047 = vmatprep.subr.bf16.mxu0 %v4079_v36  ;;  %3051 = vmatprep.mubr.msk.bf16.mxu0 %vm4080_vm5, %v4079_v36  ;;  %s2355_s7 = scalar_lea.vmem [#allocation39], %s2900_s29 }
 0xdaf   : >> { %v2246_v18 = vld [vmem:[%s2245_s12] sm:$0xff]  ;;  %v2247_v19 = vld [vmem:[%s2245_s12 + $0x8] sm:$0xff]  ;;  %3048 = vmatpush3.bf16.msra.mxu0 %v2904_v35  ;;  %p2240_p11 = scmp.ge.s32.totalorder %s2243_s6, 2  }
 0xdb0   : >> { %v2249_v23 = vsel %vm1474_vm2, %v2246_v18, 0.0  ;;  %v2252_v24 = vsel %vm1474_vm2, %v2247_v19, 0.0  ;;  %3049 = vmatprep.subr.bf16.mxu0 %v4079_v36 }
 0xdb1   : >> { %2250 = vadd.xlane.f32.xlu0 %v2249_v23 }
 0xdb3   : >> { %3050 = vmatpush3.bf16.msra.mxu0 %v2905_v37 }
 0xdb5   : >> { %2253 = vadd.xlane.f32.xlu0 %v2252_v24 }
 0xe3e   : >> { %v2251_v25 = vpop.xlane.xlu0 %2250 }
 0xe3f   : >> { %v2256_v26 = vmul.f32 0.03125, %v2251_v25 }
 0xe41   : >> { %v2258_v27 = vsub.f32 %v2246_v18, %v2256_v26 }
 0xe42   : >> { %v2254_v28 = vpop.xlane.xlu0 %2253 }
 0xe43   : >> { %v2257_v29 = vmul.f32 0.03125, %v2254_v28  ;;  %v2260_v30 = vmul.f32 %v2258_v27, %v2258_v27 }
 0xe45   : >> { %v2259_v31 = vsub.f32 %v2247_v19, %v2257_v29  ;;  %v2262_v32 = vsel %vm1474_vm2, %v2260_v30, 0.0 }
 0xe46   : >> { %2263 = vadd.xlane.f32.xlu1 %v2262_v32 }
 0xe47   : >> { %v2261_v33 = vmul.f32 %v2259_v31, %v2259_v31 }
 0xe49   : >> { %v2265_v34 = vsel %vm1474_vm2, %v2261_v33, 0.0 }
 0xe4a   : >> { %2266 = vadd.xlane.f32.xlu1 %v2265_v34 }
 0xed3   : >> { %v2264_v38 = vpop.xlane.xlu1 %2263 }
 0xed4   : >> { %v2268_v39 = vmul.f32 0.03125, %v2264_v38 }
 0xed6   : >> { %v2270_v40 = vadd.f32 1e-05, %v2268_v39 }
 0xed7   : >> { %v2267_v41 = vpop.xlane.xlu1 %2266 }
 0xed8   : >> { %3262 = vrsqrt.f32 %v2270_v40  ;;  %v2269_v42 = vmul.f32 0.03125, %v2267_v41 }
 0xeda   : >> { %v2271_v43 = vadd.f32 1e-05, %v2269_v42 }
 0xedc   : >> { %3264 = vrsqrt.f32 %v2271_v43 }
 0xee2   : >> { %v3263_v44 = vpop.eup %3262 }
 0xee3   : >> { %v2274_v45 = vmul.f32 %v3263_v44, %v2258_v27 }
 0xee5   : >> { %v2282_v48 = vmul.f32 %v5329_v10, %v2274_v45 }
 0xee6   : >> { %v3265_v46 = vpop.eup %3264 }
 0xee7   : >> { %v2275_v47 = vmul.f32 %v3265_v46, %v2259_v31  ;;  %v2290_v50 = vadd.f32 %v5331_v11, %v2282_v48 }
 0xee9   : >> { %v2283_v49 = vmul.f32 %v5329_v10, %v2275_v47 }
 0xeeb   : >> { %v2291_v51 = vadd.f32 %v5331_v11, %v2283_v49 }
 0xeed   : >> { %v2292_v52 = vpack.c.bf16 %v2291_v51, %v2290_v50 }
 0xeef   : >> { %3052 = vmatmul.mubr.msk.bf16.vlgmr.msra.gmra.mrb[0].mxu0 %vm1474_vm2, %v2292_v52 }
 0xfc1   : > { %2242 = sbr.rel (!%p2240_p11) target bundleno = 3501 (0xdad), region = 413 }
 0xfc2   : >> { %v2348_v53 = vpop.f32.mrb[0].mxu0 }
 0xfc3   : >> { %v2349_v54 = vadd.f32 %v5341_v63, %v2348_v53  ;;  %v3053_v55 = vpop.f32.mrb[1].mxu0 }
 0xfc4   : >> { %v2351_v56 = vpop.f32.mrb[2].mxu0 }
 0xfc5   : >> { %2356 = vst [vmem:[%s2355_s7] sm:$0xff] %v2349_v54  ;;  %v2352_v57 = vadd.f32 %v5341_v63, %v2351_v56  ;;  %v3054_v58 = vpop.f32.mrb[3].mxu0 }
 0xfc7   : >> { %2357 = vst [vmem:[%s2355_s7 + $0x8] sm:$0xff] %v2352_v57 }
 0xfc8 PF: > { %s5564_s5 = sld [smem:[#allocation54_spill]]  ;;  %s4081_s25 = smov [#allocation39]  }
 0xfc9   : > { %s2364_s2 = sshll.u32 %s4081_s25, 4  ;;  %s2365_s2 = int_to_ptr.vmem [resolvable:$true] %s2364_s2 }
 0xfca   : > { %s3910_s27 = scalar_lea.vmem %s2365_s2, 512  ;;  %p3917_p0 = scmp.lt.s32.totalorder %s2365_s2, %s2365_s2 }
 0xfcb   : > { %p3911_p5 = scmp.ne.s32.totalorder %s2365_s2, %s3910_s27  ;;  %p3918_p12 = scmp.lt.s32.totalorder %s3910_s27, %s3910_s27 }
 0xfcd   : > { %p3919_p3 = por %p3918_p12, %p3917_p0 }
 0xfce   : > { %p3155_p13 = scmp.eq.s32.totalorder %s5564_s5, 1 }
 0xfd0   : > { %p3912_p2 = pnand %p3911_p5, %p3155_p13 }
 0xfd2   : > { %p3913_p8 = pneg %p3912_p2 }
 0xfd4   : > { %p3920_p10 = pnand %p3919_p3, %p3913_p8 }
 0xfd6   : > { %3923 = shalt.err (!%p3920_p10)
}
 0xfd7   : > { %s5565_s8 = sld [smem:[#allocation80_spill]] }
 0xfdd   : > { %s3924_s20 = scalar_lea.hbm %s5565_s8, 512 }
 0xfde   : > { %p3925_p9 = scmp.ne.s32.totalorder %s5565_s8, %s3924_s20  ;;  %p3930_p7 = scmp.lt.u32.totalorder %s3924_s20, %s5565_s8 }
 0xfe0   : > { %p3926_p1 = pnand %p3925_p9, %p3155_p13 }
 0xfe2   : > { %p3927_p6 = pneg %p3926_p1 }
 0xfe4   : > { %p3932_p4 = pnand %p3930_p7, %p3927_p6 }
 0xfe6   : > { %3935 = shalt.err (!%p3932_p4)
}
 0xfe7   : > { %s4082_s6 = smov 128   ;;  %s4083_s29 = smov 8  }
 0xfe8   : > { %3116 = dma.vmem_to_hbm [thread:$0]  (%p3155_p13), %s2365_s2, 512, %s5565_s8, [#allocation5], %s4082_s6, %s4082_s6, %s4083_s29  }
 0xfe9   : > { %4013 = dma.done.wait (%p3155_p13), [#allocation5], 512  }
 0xfea   : > { %4015 = vsyncadd (%p3155_p13), [#allocation5], 4294966784 }
 0xfeb PF: > { %s5566_s25 = sld [smem:[#allocation55_spill]]  ;;  %s5567_s4 = sld [smem:[#allocation53_spill]] }
 0xfec   : > { %s5568_s27 = sld [smem:[#allocation56_spill]]  ;;  %s5569_s30 = smov %s4026_s24 }
 0xff1   : > { %p59_p11 = scmp.ge.s32.totalorder %s5566_s25, 4  }
 0xff2   : > { %s5570_s24 = smov %s5568_s27 }
 0xff3   :  { %61 = sbr.rel (!%p59_p11) target bundleno = 40 (0x28), region = 424 }
 0xffa   :  { %2380 = vsyncpa [#allocation4], 1 }
 0xffb   :  { %2382 = vsyncpa [#allocation4 + $0x1], 1 }
 0xffc   :  { %2383 = vsyncpa [#allocation7], 1 }
 0xffd   :  { %2384 = vsyncpa [#allocation10], 1 }
 0xffe   :  { %2386 = vsyncpa [#allocation10 + $0x1], 1 }
 0xfff   :  { %2387 = vsyncpa [#allocation13], 1 }
0x1000   :  { %2389 = vsyncpa [#allocation13 + $0x1], 1 }
0x1001   :  { %2390 = vsyncpa [#allocation16], 1 }
0x1002   :  { %2392 = vsyncpa [#allocation16 + $0x1], 1 }
0x1003   :  { %2393 = vsyncpa [#allocation19], 1 }
0x1004   :  { %2395 = vsyncpa [#allocation19 + $0x1], 1 }
0x1005   :  { %2396 = vsyncpa [#allocation22], 1 }
0x1006   :  { %2398 = vsyncpa [#allocation22 + $0x1], 1 }
0x1007   :  { %2399 = vsyncpa [#allocation25], 1 }
0x1008   :  { %2401 = vsyncpa [#allocation25 + $0x1], 1 }
0x1009   :  { %2402 = vsyncpa [#allocation28], 1 }
0x100a   :  { %2404 = vsyncpa [#allocation28 + $0x1], 1 }
0x100b   :  { %2405 = vsyncpa [#allocation31], 1 }
0x100c   :  { %2407 = vsyncpa [#allocation31 + $0x1], 1 }
0x100d   :  { %2408 = vsyncpa [#allocation34], 1 }
0x100e   :  { %2409 = vsyncpa [#allocation37], 1 }
0x100f   :  { %2410 = vsyncpa [#allocation5], 1 }
0x1010   :  { %2412 = vsyncpa [#allocation5 + $0x1], 1 }

</bundles_post_ra>
